<compile_context>
chip_gen: v7x
topology: tpu7x:2x2x1
jax: 0.10.0
libtpu: 0.0.40
codegen_flags: <defaults>
</compile_context>

<pallas_src>
import functools

import jax
import jax.numpy as jnp
from jax.experimental import pallas as pl
from jax.experimental.pallas import tpu as pltpu

EPS = 1e-5          # nn.LayerNorm default eps
NEG_INF = -1e30     # additive mask value (exp() underflows to exactly 0)


def _layer_norm(x, w, b):
    mu = jnp.mean(x, axis=-1, keepdims=True)
    var = jnp.mean((x - mu) ** 2, axis=-1, keepdims=True)
    return (x - mu) * jax.lax.rsqrt(var + EPS) * w + b


# ------------------------------ fused kernel --------------------------------


def gpt_kernel(x_ref, mask_ref,
               ln1w_ref, ln1b_ref, wqkv_ref, wo_ref, bo_ref,
               ln2w_ref, ln2b_ref, w1_ref, b1_ref, w2_ref, b2_ref,
               lnfw_ref, lnfb_ref, wh_ref,
               o_ref,
               x_scr,
               *, n_head, head_size, n_embed):
    """One transformer block per grid step; final LN + lm_head on the last."""
    bf, f32 = jnp.bfloat16, jnp.float32
    C, hs = n_embed, head_size
    scale = 1.0 / (hs ** 0.5)
    l = pl.program_id(0)

    # Residual stream lives in VMEM scratch across the layer grid axis.
    @pl.when(l == 0)
    def _():
        x_scr[...] = x_ref[...]

    x = x_scr[...]                       # (BT, C) f32
    mask = mask_ref[...]                 # (BT, BT) causal + block-diag additive

    # -------- attention: ln1 -> fused QKV -> per-head 2-D attn -> fused wo ---
    xn = _layer_norm(x, ln1w_ref[0], ln1b_ref[0])
    qkv = jnp.dot(xn.astype(bf), wqkv_ref[0],
                  preferred_element_type=f32)                    # (BT, 3C)
    heads = []
    for h in range(n_head):              # static; lane slices of the fused QKV
        q = qkv[:, h * hs:(h + 1) * hs]
        k = qkv[:, C + h * hs:C + (h + 1) * hs]
        v = qkv[:, 2 * C + h * hs:2 * C + (h + 1) * hs]
        s = jax.lax.dot_general(q.astype(bf), k.astype(bf),
                                (((1,), (1,)), ((), ())),
                                preferred_element_type=f32) * scale + mask
        p = jnp.exp(s - jnp.max(s, axis=-1, keepdims=True))
        p = p * pl.reciprocal(jnp.sum(p, axis=-1, keepdims=True), approx=True)
        heads.append(jnp.dot(p.astype(bf), v.astype(bf),
                             preferred_element_type=f32))        # (BT, hs)
    att = jnp.concatenate(heads, axis=-1)                        # (BT, C)
    x = x + jnp.dot(att.astype(bf), wo_ref[0],
                    preferred_element_type=f32) + bo_ref[0]

    # ----------------------------- ReLU MLP ----------------------------------
    xn2 = _layer_norm(x, ln2w_ref[0], ln2b_ref[0])
    h1 = jnp.dot(xn2.astype(bf), w1_ref[0],
                 preferred_element_type=f32) + b1_ref[0]
    h1 = jnp.maximum(h1, 0.0)
    x = x + jnp.dot(h1.astype(bf), w2_ref[0],
                    preferred_element_type=f32) + b2_ref[0]

    x_scr[...] = x

    # ------------- final LayerNorm + lm_head (lane-dense padded vocab) -------
    @pl.when(l == pl.num_programs(0) - 1)
    def _():
        xf = _layer_norm(x, lnfw_ref[...], lnfb_ref[...])
        o_ref[...] = jnp.dot(xf.astype(bf), wh_ref[...],
                             preferred_element_type=f32)


# ----------------------------- pallas wrapper -------------------------------

_PER_LAYER = ("ln1_w", "ln1_b", "wqkv", "wo", "bo",
              "ln2_w", "ln2_b", "w1", "b1", "w2", "b2")
_FINAL = ("ln_f_w", "ln_f_b", "w_head")


def _const_spec(shape):
    nd = len(shape)
    return pl.BlockSpec(tuple(shape), lambda l: (0,) * nd)


def _layer_spec(shape):
    _, a, b = shape
    return pl.BlockSpec((1, a, b), lambda l: (l, 0, 0))


def fused_forward(x, pk, meta, *, batch, seq_len):
    bt, C = x.shape
    L, H, hs = meta["n_layer"], meta["n_head"], meta["head_size"]
    v_pad = meta["v_pad"]

    # Combined causal + batch-block-diagonal additive mask over folded B*T rows.
    row = jax.lax.broadcasted_iota(jnp.int32, (bt, bt), 0)
    col = jax.lax.broadcasted_iota(jnp.int32, (bt, bt), 1)
    mask = jnp.where(((row // seq_len) == (col // seq_len)) & (row >= col),
                     0.0, NEG_INF).astype(jnp.float32)

    args = (x, mask) + tuple(pk[n] for n in _PER_LAYER) + tuple(pk[n] for n in _FINAL)
    in_specs = ([_const_spec(x.shape), _const_spec(mask.shape)]
                + [_layer_spec(pk[n].shape) for n in _PER_LAYER]
                + [_const_spec(pk[n].shape) for n in _FINAL])

    kern = functools.partial(gpt_kernel, n_head=H, head_size=hs, n_embed=C)

    # Advisory cost estimate so XLA schedules the embedding gather / vocab
    # slice around (not serialized on) the long custom call.
    per_layer_flops = (2 * bt * C * 3 * C                 # fused QKV
                       + H * 2 * (2 * bt * bt * hs)       # scores + PV
                       + 2 * bt * C * C                   # output projection
                       + 2 * bt * C * 4 * C               # MLP up
                       + 2 * bt * 4 * C * C)              # MLP down
    flops = L * per_layer_flops + 2 * bt * C * v_pad
    transcendentals = L * H * bt * bt + (2 * L + 1) * bt
    bytes_accessed = (sum(int(a.size) * int(a.dtype.itemsize) for a in args)
                      + bt * v_pad * 4)
    ce = pl.CostEstimate(flops=int(flops),
                         transcendentals=int(transcendentals),
                         bytes_accessed=int(bytes_accessed))

    return pl.pallas_call(
        kern,
        out_shape=jax.ShapeDtypeStruct((bt, v_pad), jnp.float32),
        grid_spec=pltpu.PrefetchScalarGridSpec(
            num_scalar_prefetch=0,
            grid=(L,),                              # layer axis: weight streaming
            in_specs=in_specs,
            out_specs=pl.BlockSpec((bt, v_pad), lambda l: (0, 0)),
            scratch_shapes=[pltpu.VMEM((bt, C), jnp.float32)],   # residual stream
        ),
        compiler_params=pltpu.CompilerParams(
            dimension_semantics=("arbitrary",)),
        cost_estimate=ce,
    )(*args)


def pack_params(params, *, n_head):
    """One-time repack: stack layers, fuse QKV on the lane axis, cast matmul
    weights to bf16, pad lm_head to a lane-dense (multiple of 128) vocab.
    All matmul weights stay lane-dense (last dim C / 3C / 4C / v_pad)."""
    blocks = params["blocks"]
    L = len(blocks)
    C = params["tok_embed"].shape[1]
    bf = jnp.bfloat16

    def stack(name):
        return jnp.stack([b[name] for b in blocks], axis=0)

    V = params["w_head"].shape[1]
    v_pad = ((V + 127) // 128) * 128
    wqkv = jnp.concatenate([stack("wq"), stack("wk"), stack("wv")], axis=2)  # (L,C,3C)

    packed = dict(
        ln1_w=stack("ln1_w")[:, None, :], ln1_b=stack("ln1_b")[:, None, :],
        wqkv=wqkv.astype(bf),
        wo=stack("wo").astype(bf),
        bo=stack("bo")[:, None, :],
        ln2_w=stack("ln2_w")[:, None, :], ln2_b=stack("ln2_b")[:, None, :],
        w1=stack("w1").astype(bf), b1=stack("b1")[:, None, :],
        w2=stack("w2").astype(bf), b2=stack("b2")[:, None, :],
        ln_f_w=params["ln_f_w"][None, :], ln_f_b=params["ln_f_b"][None, :],
        w_head=jnp.pad(params["w_head"], ((0, 0), (0, v_pad - V))).astype(bf),
    )
    meta = dict(n_layer=L, n_head=n_head, head_size=C // n_head,
                n_embed=C, vocab=V, v_pad=v_pad)
    return packed, meta


def transformer_forward(idx, params, packed, meta, *, targets=None):
    B, T = idx.shape
    C = meta["n_embed"]
    # Token-embedding gather stays as tiny XLA glue; everything else is fused.
    x = jnp.take(params["tok_embed"], idx.reshape(-1), axis=0)      # (B*T, C)
    logits_pad = fused_forward(x, packed, meta, batch=B, seq_len=T)
    logits = logits_pad[:, : meta["vocab"]].reshape(B, T, meta["vocab"])
    loss = None
    # TODO(synk): cross-entropy loss path (targets is not None) not exercised here.
    return logits, loss


# -------------------- references (pure JAX, for validation) ------------------


def ref_forward_f32(idx, params, *, n_head):
    """Exact f32 reference matching the PyTorch module's forward."""
    x = params["tok_embed"][idx]
    B, T, C = x.shape
    hs = C // n_head

    def ln(z, w, b):
        mu = jnp.mean(z, -1, keepdims=True)
        var = jnp.mean((z - mu) ** 2, -1, keepdims=True)
        return (z - mu) * jax.lax.rsqrt(var + EPS) * w + b

    mask = jnp.tril(jnp.ones((T, T), dtype=bool))
    for lp in params["blocks"]:
        xn = ln(x, lp["ln1_w"], lp["ln1_b"])
        q = (xn @ lp["wq"]).reshape(B, T, n_head, hs).transpose(0, 2, 1, 3)
        k = (xn @ lp["wk"]).reshape(B, T, n_head, hs).transpose(0, 2, 1, 3)
        v = (xn @ lp["wv"]).reshape(B, T, n_head, hs).transpose(0, 2, 1, 3)
        s = jnp.einsum("bhqd,bhkd->bhqk", q, k) / jnp.sqrt(hs)
        s = jnp.where(mask, s, jnp.finfo(jnp.float32).min)
        p = jax.nn.softmax(s, axis=-1)
        att = jnp.einsum("bhqk,bhkd->bhqd", p, v).transpose(0, 2, 1, 3).reshape(B, T, C)
        x = x + att @ lp["wo"] + lp["bo"]
        xn2 = ln(x, lp["ln2_w"], lp["ln2_b"])
        h = jnp.maximum(xn2 @ lp["w1"] + lp["b1"], 0.0)
        x = x + h @ lp["w2"] + lp["b2"]
    x = ln(x, params["ln_f_w"], params["ln_f_b"])
    return x @ params["w_head"]


def ref_forward_mixed(idx, params, *, n_head):
    """Same math with the kernel's structure and cast points (fused bf16 QKV,
    folded B*T rows, block-diagonal mask, f32 accumulation / LN / softmax).
    Only difference vs. the kernel: exact softmax divide instead of the EUP
    approximate reciprocal."""
    bf, f32 = jnp.bfloat16, jnp.float32
    x3 = params["tok_embed"][idx].astype(f32)
    B, T, C = x3.shape
    hs = C // n_head
    scale = 1.0 / (hs ** 0.5)
    bt = B * T
    x = x3.reshape(bt, C)

    row = jax.lax.broadcasted_iota(jnp.int32, (bt, bt), 0)
    col = jax.lax.broadcasted_iota(jnp.int32, (bt, bt), 1)
    mask = jnp.where(((row // T) == (col // T)) & (row >= col),
                     0.0, NEG_INF).astype(f32)

    def ln(z, w, b):
        mu = jnp.mean(z, -1, keepdims=True)
        var = jnp.mean((z - mu) ** 2, -1, keepdims=True)
        return (z - mu) * jax.lax.rsqrt(var + EPS) * w + b

    for lp in params["blocks"]:
        xn = ln(x, lp["ln1_w"], lp["ln1_b"])
        wqkv = jnp.concatenate([lp["wq"], lp["wk"], lp["wv"]], axis=1).astype(bf)
        qkv = jnp.dot(xn.astype(bf), wqkv, preferred_element_type=f32)
        heads = []
        for h in range(n_head):
            q = qkv[:, h * hs:(h + 1) * hs]
            k = qkv[:, C + h * hs:C + (h + 1) * hs]
            v = qkv[:, 2 * C + h * hs:2 * C + (h + 1) * hs]
            s = jax.lax.dot_general(q.astype(bf), k.astype(bf),
                                    (((1,), (1,)), ((), ())),
                                    preferred_element_type=f32) * scale + mask
            p = jnp.exp(s - jnp.max(s, -1, keepdims=True))
            p = p / jnp.sum(p, -1, keepdims=True)
            heads.append(jnp.dot(p.astype(bf), v.astype(bf),
                                 preferred_element_type=f32))
        att = jnp.concatenate(heads, axis=-1)
        x = x + jnp.dot(att.astype(bf), lp["wo"].astype(bf),
                        preferred_element_type=f32) + lp["bo"]
        xn2 = ln(x, lp["ln2_w"], lp["ln2_b"])
        h1 = jnp.dot(xn2.astype(bf), lp["w1"].astype(bf),
                     preferred_element_type=f32) + lp["b1"]
        h1 = jnp.maximum(h1, 0.0)
        x = x + jnp.dot(h1.astype(bf), lp["w2"].astype(bf),
                        preferred_element_type=f32) + lp["b2"]
    xf = ln(x, params["ln_f_w"], params["ln_f_b"])
    logits = jnp.dot(xf.astype(bf), params["w_head"].astype(bf),
                     preferred_element_type=f32)
    return logits.reshape(B, T, -1)


# ----------------------------- parameter init --------------------------------


def init_params(key, *, vocab, n_embed, n_head, n_layer):
    ks = iter(jax.random.split(key, 8 + 16 * n_layer))

    def nrm(shape, scale=0.05):
        return scale * jax.random.normal(next(ks), shape, dtype=jnp.float32)

    C, H4 = n_embed, 4 * n_embed
    blocks = []
    for _ in range(n_layer):
        blocks.append(dict(
            ln1_w=jnp.ones((C,), jnp.float32), ln1_b=jnp.zeros((C,), jnp.float32),
            wq=nrm((C, C)), wk=nrm((C, C)), wv=nrm((C, C)),
            wo=nrm((C, C)), bo=nrm((C,)),
            ln2_w=jnp.ones((C,), jnp.float32), ln2_b=jnp.zeros((C,), jnp.float32),
            w1=nrm((C, H4)), b1=nrm((H4,)),
            w2=nrm((H4, C)), b2=nrm((C,)),
        ))
    return dict(
        tok_embed=nrm((vocab, C)),
        blocks=blocks,
        ln_f_w=jnp.ones((C,), jnp.float32),
        ln_f_b=jnp.zeros((C,), jnp.float32),
        w_head=nrm((C, vocab)),
    )


# ----------------------------------- main -------------------------------------

if __name__ == "__main__":
    # config: VOCAB_SIZE=64, BLOCK_SIZE=8, N_EMBED=32, N_HEAD=4, N_LAYER=2,
    #         DROPOUT=0.0 (eval), BIAS=True
    VOCAB, T, C, N_HEAD, N_LAYER, B = 64, 8, 32, 4, 2, 2

    key = jax.random.PRNGKey(0)
    k_par, k_idx = jax.random.split(key)
    params = init_params(k_par, vocab=VOCAB, n_embed=C,
                         n_head=N_HEAD, n_layer=N_LAYER)
    idx = jax.random.randint(k_idx, (B, T), 0, VOCAB, dtype=jnp.int32)

    packed, meta = pack_params(params, n_head=N_HEAD)
    logits, loss = transformer_forward(idx, params, packed, meta)
    logits = jax.block_until_ready(logits)
    assert logits.shape == (B, T, VOCAB) and loss is None

    # (1) structural check vs. the precision-matched reference (tolerance
    #     covers the approx=True EUP reciprocal in the kernel's softmax).
    ref_m = ref_forward_mixed(idx, params, n_head=N_HEAD)
    err_m = jnp.max(jnp.abs(logits - ref_m))
    assert jnp.allclose(logits, ref_m, rtol=1e-2, atol=1e-2), \
        f"mixed-precision reference mismatch: max err {err_m}"

    # (2) loose envelope check vs. the exact f32 PyTorch-faithful reference
    #     (covers bf16-matmul / f32 drift at this depth).
    ref_f = ref_forward_f32(idx, params, n_head=N_HEAD)
    err_f = jnp.max(jnp.abs(logits - ref_f))
    assert jnp.allclose(logits, ref_f, rtol=1e-1, atol=1e-1), \
        f"f32 envelope exceeded: max err {err_f}"

    print("KERNEL_OK")
</pallas_src>

<mosaic_0001>
module attributes {stable_mosaic.version = 11 : i64} {
  func.func @gpt_kernel(%arg0: i32, %arg1: memref<16x32xf32, #tpu.memory_space<vmem>>, %arg2: memref<16x16xf32, #tpu.memory_space<vmem>>, %arg3: memref<1x1x32xf32, #tpu.memory_space<vmem>>, %arg4: memref<1x1x32xf32, #tpu.memory_space<vmem>>, %arg5: memref<1x32x96xbf16, #tpu.memory_space<vmem>>, %arg6: memref<1x32x32xbf16, #tpu.memory_space<vmem>>, %arg7: memref<1x1x32xf32, #tpu.memory_space<vmem>>, %arg8: memref<1x1x32xf32, #tpu.memory_space<vmem>>, %arg9: memref<1x1x32xf32, #tpu.memory_space<vmem>>, %arg10: memref<1x32x128xbf16, #tpu.memory_space<vmem>>, %arg11: memref<1x1x128xf32, #tpu.memory_space<vmem>>, %arg12: memref<1x128x32xbf16, #tpu.memory_space<vmem>>, %arg13: memref<1x1x32xf32, #tpu.memory_space<vmem>>, %arg14: memref<1x32xf32, #tpu.memory_space<vmem>>, %arg15: memref<1x32xf32, #tpu.memory_space<vmem>>, %arg16: memref<32x128xbf16, #tpu.memory_space<vmem>>, %arg17: memref<16x128xf32, #tpu.memory_space<vmem>>, %arg18: memref<16x32xf32, #tpu.memory_space<vmem>>) attributes {dimension_semantics = [#tpu.dimension_semantics<arbitrary>], iteration_bounds = array<i64: 2>, scalar_prefetch = 0 : i64, scratch_operands = 1 : i64, tpu.core_type = #tpu.core_type<tc>, window_params = [{pipeline_mode = #tpu.pipeline_mode<synchronous>, transform_indices = @transform_0, window_bounds = array<i64: 16, 32>}, {pipeline_mode = #tpu.pipeline_mode<synchronous>, transform_indices = @transform_1, window_bounds = array<i64: 16, 16>}, {transform_indices = @transform_2, window_bounds = array<i64: 1, 1, 32>}, {transform_indices = @transform_3, window_bounds = array<i64: 1, 1, 32>}, {transform_indices = @transform_4, window_bounds = array<i64: 1, 32, 96>}, {transform_indices = @transform_5, window_bounds = array<i64: 1, 32, 32>}, {transform_indices = @transform_6, window_bounds = array<i64: 1, 1, 32>}, {transform_indices = @transform_7, window_bounds = array<i64: 1, 1, 32>}, {transform_indices = @transform_8, window_bounds = array<i64: 1, 1, 32>}, {transform_indices = @transform_9, window_bounds = array<i64: 1, 32, 128>}, {transform_indices = @transform_10, window_bounds = array<i64: 1, 1, 128>}, {transform_indices = @transform_11, window_bounds = array<i64: 1, 128, 32>}, {transform_indices = @transform_12, window_bounds = array<i64: 1, 1, 32>}, {pipeline_mode = #tpu.pipeline_mode<synchronous>, transform_indices = @transform_13, window_bounds = array<i64: 1, 32>}, {pipeline_mode = #tpu.pipeline_mode<synchronous>, transform_indices = @transform_14, window_bounds = array<i64: 1, 32>}, {pipeline_mode = #tpu.pipeline_mode<synchronous>, transform_indices = @transform_15, window_bounds = array<i64: 32, 128>}, {pipeline_mode = #tpu.pipeline_mode<synchronous>, transform_indices = @transform_16, window_bounds = array<i64: 16, 128>}]} {
    %c0_i32 = arith.constant 0 : i32
    %0 = arith.cmpi eq, %arg0, %c0_i32 : i32
    %1 = arith.extui %0 : i1 to i32
    %c0_i32_0 = arith.constant 0 : i32
    %2 = arith.cmpi ne, %1, %c0_i32_0 : i32
    scf.if %2 {
      %c0_74 = arith.constant 0 : index
      %c0_75 = arith.constant 0 : index
      %182 = vector.load %arg1[%c0_74, %c0_75] : memref<16x32xf32, #tpu.memory_space<vmem>>, vector<16x32xf32>
      %c0_76 = arith.constant 0 : index
      %c0_77 = arith.constant 0 : index
      %183 = vector.load %arg18[%c0_76, %c0_77] : memref<16x32xf32, #tpu.memory_space<vmem>>, vector<16x32xf32>
      tpu.vector_store %arg18[%c0_76, %c0_77], %182 {strides = array<i32>} : memref<16x32xf32, #tpu.memory_space<vmem>>, vector<16x32xf32>,
    } else {
    }
    %c0 = arith.constant 0 : index
    %c0_1 = arith.constant 0 : index
    %3 = vector.load %arg18[%c0, %c0_1] : memref<16x32xf32, #tpu.memory_space<vmem>>, vector<16x32xf32>
    %c0_2 = arith.constant 0 : index
    %c0_3 = arith.constant 0 : index
    %4 = vector.load %arg2[%c0_2, %c0_3] : memref<16x16xf32, #tpu.memory_space<vmem>>, vector<16x16xf32>
    %c0_4 = arith.constant 0 : index
    %c0_5 = arith.constant 0 : index
    %c0_6 = arith.constant 0 : index
    %5 = vector.load %arg3[%c0_4, %c0_5, %c0_6] : memref<1x1x32xf32, #tpu.memory_space<vmem>>, vector<1x1x32xf32>
    %6 = vector.shape_cast %5 : vector<1x1x32xf32> to vector<1x32xf32>
    %c0_7 = arith.constant 0 : index
    %c0_8 = arith.constant 0 : index
    %c0_9 = arith.constant 0 : index
    %7 = vector.load %arg4[%c0_7, %c0_8, %c0_9] : memref<1x1x32xf32, #tpu.memory_space<vmem>>, vector<1x1x32xf32>
    %8 = vector.shape_cast %7 : vector<1x1x32xf32> to vector<1x32xf32>
    %cst = arith.constant dense<0.000000e+00> : vector<16xf32>
    %9 = vector.multi_reduction <add>, %3, %cst [1] : vector<16x32xf32> to vector<16xf32>
    %10 = vector.shape_cast %9 : vector<16xf32> to vector<16x1xf32>
    %cst_10 = arith.constant 3.200000e+01 : f32
    %11 = vector.broadcast %cst_10 : f32 to vector<16x1xf32>
    %12 = arith.divf %10, %11 : vector<16x1xf32>
    %13 = vector.broadcast %12 : vector<16x1xf32> to vector<16x32xf32>
    %14 = arith.subf %3, %13 : vector<16x32xf32>
    %15 = arith.mulf %14, %14 : vector<16x32xf32>
    %cst_11 = arith.constant dense<0.000000e+00> : vector<16xf32>
    %16 = vector.multi_reduction <add>, %15, %cst_11 [1] : vector<16x32xf32> to vector<16xf32>
    %17 = vector.shape_cast %16 : vector<16xf32> to vector<16x1xf32>
    %cst_12 = arith.constant 3.200000e+01 : f32
    %18 = vector.broadcast %cst_12 : f32 to vector<16x1xf32>
    %19 = arith.divf %17, %18 : vector<16x1xf32>
    %20 = vector.broadcast %12 : vector<16x1xf32> to vector<16x32xf32>
    %21 = arith.subf %3, %20 : vector<16x32xf32>
    %cst_13 = arith.constant 9.99999974E-6 : f32
    %22 = vector.broadcast %cst_13 : f32 to vector<16x1xf32>
    %23 = arith.addf %19, %22 : vector<16x1xf32>
    %24 = math.rsqrt %23 : vector<16x1xf32>
    %25 = vector.broadcast %24 : vector<16x1xf32> to vector<16x32xf32>
    %26 = arith.mulf %21, %25 : vector<16x32xf32>
    %27 = vector.broadcast %6 : vector<1x32xf32> to vector<16x32xf32>
    %28 = arith.mulf %26, %27 : vector<16x32xf32>
    %29 = vector.broadcast %8 : vector<1x32xf32> to vector<16x32xf32>
    %30 = arith.addf %28, %29 : vector<16x32xf32>
    %31 = arith.truncf %30 : vector<16x32xf32> to vector<16x32xbf16>
    %c0_14 = arith.constant 0 : index
    %c0_15 = arith.constant 0 : index
    %c0_16 = arith.constant 0 : index
    %32 = vector.load %arg5[%c0_14, %c0_15, %c0_16] : memref<1x32x96xbf16, #tpu.memory_space<vmem>>, vector<1x32x96xbf16>
    %33 = vector.shape_cast %32 : vector<1x32x96xbf16> to vector<32x96xbf16>
    %cst_17 = arith.constant dense<0.000000e+00> : vector<16x96xf32>
    %34 = tpu.matmul %31, %33, %cst_17 {dimension_numbers = #tpu.dot_dimension_numbers<[1], [0], [0], [1], [0, 0, 1, 1], [], []>} : vector<16x32xbf16>, vector<32x96xbf16>, vector<16x96xf32> -> vector<16x96xf32>
    %35 = vector.extract_strided_slice %34 {offsets = [0, 0], sizes = [16, 8], strides = [1, 1]} : vector<16x96xf32> to vector<16x8xf32>
    %36 = vector.extract_strided_slice %34 {offsets = [0, 32], sizes = [16, 8], strides = [1, 1]} : vector<16x96xf32> to vector<16x8xf32>
    %37 = vector.extract_strided_slice %34 {offsets = [0, 64], sizes = [16, 8], strides = [1, 1]} : vector<16x96xf32> to vector<16x8xf32>
    %38 = arith.truncf %35 : vector<16x8xf32> to vector<16x8xbf16>
    %39 = arith.truncf %36 : vector<16x8xf32> to vector<16x8xbf16>
    %cst_18 = arith.constant dense<0.000000e+00> : vector<16x16xf32>
    %40 = tpu.matmul %38, %39, %cst_18 {dimension_numbers = #tpu.dot_dimension_numbers<[1], [1], [0], [0], [0, 0, 1, 0], [], []>} : vector<16x8xbf16>, vector<16x8xbf16>, vector<16x16xf32> -> vector<16x16xf32>
    %cst_19 = arith.constant 0.353553385 : f32
    %41 = vector.broadcast %cst_19 : f32 to vector<16x16xf32>
    %42 = arith.mulf %40, %41 : vector<16x16xf32>
    %43 = arith.addf %42, %4 : vector<16x16xf32>
    %cst_20 = arith.constant dense<0xFF800000> : vector<16xf32>
    %44 = vector.multi_reduction <maximumf>, %43, %cst_20 [1] : vector<16x16xf32> to vector<16xf32>
    %45 = vector.shape_cast %44 : vector<16xf32> to vector<16x1xf32>
    %46 = vector.broadcast %45 : vector<16x1xf32> to vector<16x16xf32>
    %47 = arith.subf %43, %46 : vector<16x16xf32>
    %48 = math.exp %47 : vector<16x16xf32>
    %cst_21 = arith.constant dense<0.000000e+00> : vector<16xf32>
    %49 = vector.multi_reduction <add>, %48, %cst_21 [1] : vector<16x16xf32> to vector<16xf32>
    %50 = vector.shape_cast %49 : vector<16xf32> to vector<16x1xf32>
    %51 = tpu.reciprocal %50 {approx = true} : vector<16x1xf32> -> vector<16x1xf32>
    %52 = vector.broadcast %51 : vector<16x1xf32> to vector<16x16xf32>
    %53 = arith.mulf %48, %52 : vector<16x16xf32>
    %54 = arith.truncf %53 : vector<16x16xf32> to vector<16x16xbf16>
    %55 = arith.truncf %37 : vector<16x8xf32> to vector<16x8xbf16>
    %cst_22 = arith.constant dense<0.000000e+00> : vector<16x8xf32>
    %56 = tpu.matmul %54, %55, %cst_22 {dimension_numbers = #tpu.dot_dimension_numbers<[1], [0], [0], [1], [0, 0, 1, 1], [], []>} : vector<16x16xbf16>, vector<16x8xbf16>, vector<16x8xf32> -> vector<16x8xf32>
    %57 = vector.extract_strided_slice %34 {offsets = [0, 8], sizes = [16, 8], strides = [1, 1]} : vector<16x96xf32> to vector<16x8xf32>
    %58 = vector.extract_strided_slice %34 {offsets = [0, 40], sizes = [16, 8], strides = [1, 1]} : vector<16x96xf32> to vector<16x8xf32>
    %59 = vector.extract_strided_slice %34 {offsets = [0, 72], sizes = [16, 8], strides = [1, 1]} : vector<16x96xf32> to vector<16x8xf32>
    %60 = arith.truncf %57 : vector<16x8xf32> to vector<16x8xbf16>
    %61 = arith.truncf %58 : vector<16x8xf32> to vector<16x8xbf16>
    %cst_23 = arith.constant dense<0.000000e+00> : vector<16x16xf32>
    %62 = tpu.matmul %60, %61, %cst_23 {dimension_numbers = #tpu.dot_dimension_numbers<[1], [1], [0], [0], [0, 0, 1, 0], [], []>} : vector<16x8xbf16>, vector<16x8xbf16>, vector<16x16xf32> -> vector<16x16xf32>
    %cst_24 = arith.constant 0.353553385 : f32
    %63 = vector.broadcast %cst_24 : f32 to vector<16x16xf32>
    %64 = arith.mulf %62, %63 : vector<16x16xf32>
    %65 = arith.addf %64, %4 : vector<16x16xf32>
    %cst_25 = arith.constant dense<0xFF800000> : vector<16xf32>
    %66 = vector.multi_reduction <maximumf>, %65, %cst_25 [1] : vector<16x16xf32> to vector<16xf32>
    %67 = vector.shape_cast %66 : vector<16xf32> to vector<16x1xf32>
    %68 = vector.broadcast %67 : vector<16x1xf32> to vector<16x16xf32>
    %69 = arith.subf %65, %68 : vector<16x16xf32>
    %70 = math.exp %69 : vector<16x16xf32>
    %cst_26 = arith.constant dense<0.000000e+00> : vector<16xf32>
    %71 = vector.multi_reduction <add>, %70, %cst_26 [1] : vector<16x16xf32> to vector<16xf32>
    %72 = vector.shape_cast %71 : vector<16xf32> to vector<16x1xf32>
    %73 = tpu.reciprocal %72 {approx = true} : vector<16x1xf32> -> vector<16x1xf32>
    %74 = vector.broadcast %73 : vector<16x1xf32> to vector<16x16xf32>
    %75 = arith.mulf %70, %74 : vector<16x16xf32>
    %76 = arith.truncf %75 : vector<16x16xf32> to vector<16x16xbf16>
    %77 = arith.truncf %59 : vector<16x8xf32> to vector<16x8xbf16>
    %cst_27 = arith.constant dense<0.000000e+00> : vector<16x8xf32>
    %78 = tpu.matmul %76, %77, %cst_27 {dimension_numbers = #tpu.dot_dimension_numbers<[1], [0], [0], [1], [0, 0, 1, 1], [], []>} : vector<16x16xbf16>, vector<16x8xbf16>, vector<16x8xf32> -> vector<16x8xf32>
    %79 = vector.extract_strided_slice %34 {offsets = [0, 16], sizes = [16, 8], strides = [1, 1]} : vector<16x96xf32> to vector<16x8xf32>
    %80 = vector.extract_strided_slice %34 {offsets = [0, 48], sizes = [16, 8], strides = [1, 1]} : vector<16x96xf32> to vector<16x8xf32>
    %81 = vector.extract_strided_slice %34 {offsets = [0, 80], sizes = [16, 8], strides = [1, 1]} : vector<16x96xf32> to vector<16x8xf32>
    %82 = arith.truncf %79 : vector<16x8xf32> to vector<16x8xbf16>
    %83 = arith.truncf %80 : vector<16x8xf32> to vector<16x8xbf16>
    %cst_28 = arith.constant dense<0.000000e+00> : vector<16x16xf32>
    %84 = tpu.matmul %82, %83, %cst_28 {dimension_numbers = #tpu.dot_dimension_numbers<[1], [1], [0], [0], [0, 0, 1, 0], [], []>} : vector<16x8xbf16>, vector<16x8xbf16>, vector<16x16xf32> -> vector<16x16xf32>
    %cst_29 = arith.constant 0.353553385 : f32
    %85 = vector.broadcast %cst_29 : f32 to vector<16x16xf32>
    %86 = arith.mulf %84, %85 : vector<16x16xf32>
    %87 = arith.addf %86, %4 : vector<16x16xf32>
    %cst_30 = arith.constant dense<0xFF800000> : vector<16xf32>
    %88 = vector.multi_reduction <maximumf>, %87, %cst_30 [1] : vector<16x16xf32> to vector<16xf32>
    %89 = vector.shape_cast %88 : vector<16xf32> to vector<16x1xf32>
    %90 = vector.broadcast %89 : vector<16x1xf32> to vector<16x16xf32>
    %91 = arith.subf %87, %90 : vector<16x16xf32>
    %92 = math.exp %91 : vector<16x16xf32>
    %cst_31 = arith.constant dense<0.000000e+00> : vector<16xf32>
    %93 = vector.multi_reduction <add>, %92, %cst_31 [1] : vector<16x16xf32> to vector<16xf32>
    %94 = vector.shape_cast %93 : vector<16xf32> to vector<16x1xf32>
    %95 = tpu.reciprocal %94 {approx = true} : vector<16x1xf32> -> vector<16x1xf32>
    %96 = vector.broadcast %95 : vector<16x1xf32> to vector<16x16xf32>
    %97 = arith.mulf %92, %96 : vector<16x16xf32>
    %98 = arith.truncf %97 : vector<16x16xf32> to vector<16x16xbf16>
    %99 = arith.truncf %81 : vector<16x8xf32> to vector<16x8xbf16>
    %cst_32 = arith.constant dense<0.000000e+00> : vector<16x8xf32>
    %100 = tpu.matmul %98, %99, %cst_32 {dimension_numbers = #tpu.dot_dimension_numbers<[1], [0], [0], [1], [0, 0, 1, 1], [], []>} : vector<16x16xbf16>, vector<16x8xbf16>, vector<16x8xf32> -> vector<16x8xf32>
    %101 = vector.extract_strided_slice %34 {offsets = [0, 24], sizes = [16, 8], strides = [1, 1]} : vector<16x96xf32> to vector<16x8xf32>
    %102 = vector.extract_strided_slice %34 {offsets = [0, 56], sizes = [16, 8], strides = [1, 1]} : vector<16x96xf32> to vector<16x8xf32>
    %103 = vector.extract_strided_slice %34 {offsets = [0, 88], sizes = [16, 8], strides = [1, 1]} : vector<16x96xf32> to vector<16x8xf32>
    %104 = arith.truncf %101 : vector<16x8xf32> to vector<16x8xbf16>
    %105 = arith.truncf %102 : vector<16x8xf32> to vector<16x8xbf16>
    %cst_33 = arith.constant dense<0.000000e+00> : vector<16x16xf32>
    %106 = tpu.matmul %104, %105, %cst_33 {dimension_numbers = #tpu.dot_dimension_numbers<[1], [1], [0], [0], [0, 0, 1, 0], [], []>} : vector<16x8xbf16>, vector<16x8xbf16>, vector<16x16xf32> -> vector<16x16xf32>
    %cst_34 = arith.constant 0.353553385 : f32
    %107 = vector.broadcast %cst_34 : f32 to vector<16x16xf32>
    %108 = arith.mulf %106, %107 : vector<16x16xf32>
    %109 = arith.addf %108, %4 : vector<16x16xf32>
    %cst_35 = arith.constant dense<0xFF800000> : vector<16xf32>
    %110 = vector.multi_reduction <maximumf>, %109, %cst_35 [1] : vector<16x16xf32> to vector<16xf32>
    %111 = vector.shape_cast %110 : vector<16xf32> to vector<16x1xf32>
    %112 = vector.broadcast %111 : vector<16x1xf32> to vector<16x16xf32>
    %113 = arith.subf %109, %112 : vector<16x16xf32>
    %114 = math.exp %113 : vector<16x16xf32>
    %cst_36 = arith.constant dense<0.000000e+00> : vector<16xf32>
    %115 = vector.multi_reduction <add>, %114, %cst_36 [1] : vector<16x16xf32> to vector<16xf32>
    %116 = vector.shape_cast %115 : vector<16xf32> to vector<16x1xf32>
    %117 = tpu.reciprocal %116 {approx = true} : vector<16x1xf32> -> vector<16x1xf32>
    %118 = vector.broadcast %117 : vector<16x1xf32> to vector<16x16xf32>
    %119 = arith.mulf %114, %118 : vector<16x16xf32>
    %120 = arith.truncf %119 : vector<16x16xf32> to vector<16x16xbf16>
    %121 = arith.truncf %103 : vector<16x8xf32> to vector<16x8xbf16>
    %cst_37 = arith.constant dense<0.000000e+00> : vector<16x8xf32>
    %122 = tpu.matmul %120, %121, %cst_37 {dimension_numbers = #tpu.dot_dimension_numbers<[1], [0], [0], [1], [0, 0, 1, 1], [], []>} : vector<16x16xbf16>, vector<16x8xbf16>, vector<16x8xf32> -> vector<16x8xf32>
    %123 = tpu.concatenate %56, %78, %100, %122 in 1 : vector<16x8xf32>, vector<16x8xf32>, vector<16x8xf32>, vector<16x8xf32> -> vector<16x32xf32>
    %124 = arith.truncf %123 : vector<16x32xf32> to vector<16x32xbf16>
    %c0_38 = arith.constant 0 : index
    %c0_39 = arith.constant 0 : index
    %c0_40 = arith.constant 0 : index
    %125 = vector.load %arg6[%c0_38, %c0_39, %c0_40] : memref<1x32x32xbf16, #tpu.memory_space<vmem>>, vector<1x32x32xbf16>
    %126 = vector.shape_cast %125 : vector<1x32x32xbf16> to vector<32x32xbf16>
    %cst_41 = arith.constant dense<0.000000e+00> : vector<16x32xf32>
    %127 = tpu.matmul %124, %126, %cst_41 {dimension_numbers = #tpu.dot_dimension_numbers<[1], [0], [0], [1], [0, 0, 1, 1], [], []>} : vector<16x32xbf16>, vector<32x32xbf16>, vector<16x32xf32> -> vector<16x32xf32>
    %128 = arith.addf %3, %127 : vector<16x32xf32>
    %c0_42 = arith.constant 0 : index
    %c0_43 = arith.constant 0 : index
    %c0_44 = arith.constant 0 : index
    %129 = vector.load %arg7[%c0_42, %c0_43, %c0_44] : memref<1x1x32xf32, #tpu.memory_space<vmem>>, vector<1x1x32xf32>
    %130 = vector.shape_cast %129 : vector<1x1x32xf32> to vector<1x32xf32>
    %131 = vector.broadcast %130 : vector<1x32xf32> to vector<16x32xf32>
    %132 = arith.addf %128, %131 : vector<16x32xf32>
    %c0_45 = arith.constant 0 : index
    %c0_46 = arith.constant 0 : index
    %c0_47 = arith.constant 0 : index
    %133 = vector.load %arg8[%c0_45, %c0_46, %c0_47] : memref<1x1x32xf32, #tpu.memory_space<vmem>>, vector<1x1x32xf32>
    %134 = vector.shape_cast %133 : vector<1x1x32xf32> to vector<1x32xf32>
    %c0_48 = arith.constant 0 : index
    %c0_49 = arith.constant 0 : index
    %c0_50 = arith.constant 0 : index
    %135 = vector.load %arg9[%c0_48, %c0_49, %c0_50] : memref<1x1x32xf32, #tpu.memory_space<vmem>>, vector<1x1x32xf32>
    %136 = vector.shape_cast %135 : vector<1x1x32xf32> to vector<1x32xf32>
    %cst_51 = arith.constant dense<0.000000e+00> : vector<16xf32>
    %137 = vector.multi_reduction <add>, %132, %cst_51 [1] : vector<16x32xf32> to vector<16xf32>
    %138 = vector.shape_cast %137 : vector<16xf32> to vector<16x1xf32>
    %cst_52 = arith.constant 3.200000e+01 : f32
    %139 = vector.broadcast %cst_52 : f32 to vector<16x1xf32>
    %140 = arith.divf %138, %139 : vector<16x1xf32>
    %141 = vector.broadcast %140 : vector<16x1xf32> to vector<16x32xf32>
    %142 = arith.subf %132, %141 : vector<16x32xf32>
    %143 = arith.mulf %142, %142 : vector<16x32xf32>
    %cst_53 = arith.constant dense<0.000000e+00> : vector<16xf32>
    %144 = vector.multi_reduction <add>, %143, %cst_53 [1] : vector<16x32xf32> to vector<16xf32>
    %145 = vector.shape_cast %144 : vector<16xf32> to vector<16x1xf32>
    %cst_54 = arith.constant 3.200000e+01 : f32
    %146 = vector.broadcast %cst_54 : f32 to vector<16x1xf32>
    %147 = arith.divf %145, %146 : vector<16x1xf32>
    %148 = vector.broadcast %140 : vector<16x1xf32> to vector<16x32xf32>
    %149 = arith.subf %132, %148 : vector<16x32xf32>
    %cst_55 = arith.constant 9.99999974E-6 : f32
    %150 = vector.broadcast %cst_55 : f32 to vector<16x1xf32>
    %151 = arith.addf %147, %150 : vector<16x1xf32>
    %152 = math.rsqrt %151 : vector<16x1xf32>
    %153 = vector.broadcast %152 : vector<16x1xf32> to vector<16x32xf32>
    %154 = arith.mulf %149, %153 : vector<16x32xf32>
    %155 = vector.broadcast %134 : vector<1x32xf32> to vector<16x32xf32>
    %156 = arith.mulf %154, %155 : vector<16x32xf32>
    %157 = vector.broadcast %136 : vector<1x32xf32> to vector<16x32xf32>
    %158 = arith.addf %156, %157 : vector<16x32xf32>
    %159 = arith.truncf %158 : vector<16x32xf32> to vector<16x32xbf16>
    %c0_56 = arith.constant 0 : index
    %c0_57 = arith.constant 0 : index
    %c0_58 = arith.constant 0 : index
    %160 = vector.load %arg10[%c0_56, %c0_57, %c0_58] : memref<1x32x128xbf16, #tpu.memory_space<vmem>>, vector<1x32x128xbf16>
    %161 = vector.shape_cast %160 : vector<1x32x128xbf16> to vector<32x128xbf16>
    %cst_59 = arith.constant dense<0.000000e+00> : vector<16x128xf32>
    %162 = tpu.matmul %159, %161, %cst_59 {dimension_numbers = #tpu.dot_dimension_numbers<[1], [0], [0], [1], [0, 0, 1, 1], [], []>} : vector<16x32xbf16>, vector<32x128xbf16>, vector<16x128xf32> -> vector<16x128xf32>
    %c0_60 = arith.constant 0 : index
    %c0_61 = arith.constant 0 : index
    %c0_62 = arith.constant 0 : index
    %163 = vector.load %arg11[%c0_60, %c0_61, %c0_62] : memref<1x1x128xf32, #tpu.memory_space<vmem>>, vector<1x1x128xf32>
    %164 = vector.shape_cast %163 : vector<1x1x128xf32> to vector<1x128xf32>
    %165 = vector.broadcast %164 : vector<1x128xf32> to vector<16x128xf32>
    %166 = arith.addf %162, %165 : vector<16x128xf32>
    %cst_63 = arith.constant 0.000000e+00 : f32
    %167 = vector.broadcast %cst_63 : f32 to vector<16x128xf32>
    %168 = arith.maximumf %166, %167 : vector<16x128xf32>
    %169 = arith.truncf %168 : vector<16x128xf32> to vector<16x128xbf16>
    %c0_64 = arith.constant 0 : index
    %c0_65 = arith.constant 0 : index
    %c0_66 = arith.constant 0 : index
    %170 = vector.load %arg12[%c0_64, %c0_65, %c0_66] : memref<1x128x32xbf16, #tpu.memory_space<vmem>>, vector<1x128x32xbf16>
    %171 = vector.shape_cast %170 : vector<1x128x32xbf16> to vector<128x32xbf16>
    %cst_67 = arith.constant dense<0.000000e+00> : vector<16x32xf32>
    %172 = tpu.matmul %169, %171, %cst_67 {dimension_numbers = #tpu.dot_dimension_numbers<[1], [0], [0], [1], [0, 0, 1, 1], [], []>} : vector<16x128xbf16>, vector<128x32xbf16>, vector<16x32xf32> -> vector<16x32xf32>
    %173 = arith.addf %132, %172 : vector<16x32xf32>
    %c0_68 = arith.constant 0 : index
    %c0_69 = arith.constant 0 : index
    %c0_70 = arith.constant 0 : index
    %174 = vector.load %arg13[%c0_68, %c0_69, %c0_70] : memref<1x1x32xf32, #tpu.memory_space<vmem>>, vector<1x1x32xf32>
    %175 = vector.shape_cast %174 : vector<1x1x32xf32> to vector<1x32xf32>
    %176 = vector.broadcast %175 : vector<1x32xf32> to vector<16x32xf32>
    %177 = arith.addf %173, %176 : vector<16x32xf32>
    %c0_71 = arith.constant 0 : index
    %c0_72 = arith.constant 0 : index
    %178 = vector.load %arg18[%c0_71, %c0_72] : memref<16x32xf32, #tpu.memory_space<vmem>>, vector<16x32xf32>
    tpu.vector_store %arg18[%c0_71, %c0_72], %177 {strides = array<i32>} : memref<16x32xf32, #tpu.memory_space<vmem>>, vector<16x32xf32>,
    %c1_i32 = arith.constant 1 : i32
    %179 = arith.cmpi eq, %arg0, %c1_i32 : i32
    %180 = arith.extui %179 : i1 to i32
    %c0_i32_73 = arith.constant 0 : i32
    %181 = arith.cmpi ne, %180, %c0_i32_73 : i32
    scf.if %181 {
      %c0_74 = arith.constant 0 : index
      %c0_75 = arith.constant 0 : index
      %182 = vector.load %arg14[%c0_74, %c0_75] : memref<1x32xf32, #tpu.memory_space<vmem>>, vector<1x32xf32>
      %c0_76 = arith.constant 0 : index
      %c0_77 = arith.constant 0 : index
      %183 = vector.load %arg15[%c0_76, %c0_77] : memref<1x32xf32, #tpu.memory_space<vmem>>, vector<1x32xf32>
      %cst_78 = arith.constant dense<0.000000e+00> : vector<16xf32>
      %184 = vector.multi_reduction <add>, %177, %cst_78 [1] : vector<16x32xf32> to vector<16xf32>
      %185 = vector.shape_cast %184 : vector<16xf32> to vector<16x1xf32>
      %cst_79 = arith.constant 3.200000e+01 : f32
      %186 = vector.broadcast %cst_79 : f32 to vector<16x1xf32>
      %187 = arith.divf %185, %186 : vector<16x1xf32>
      %188 = vector.broadcast %187 : vector<16x1xf32> to vector<16x32xf32>
      %189 = arith.subf %177, %188 : vector<16x32xf32>
      %190 = arith.mulf %189, %189 : vector<16x32xf32>
      %cst_80 = arith.constant dense<0.000000e+00> : vector<16xf32>
      %191 = vector.multi_reduction <add>, %190, %cst_80 [1] : vector<16x32xf32> to vector<16xf32>
      %192 = vector.shape_cast %191 : vector<16xf32> to vector<16x1xf32>
      %cst_81 = arith.constant 3.200000e+01 : f32
      %193 = vector.broadcast %cst_81 : f32 to vector<16x1xf32>
      %194 = arith.divf %192, %193 : vector<16x1xf32>
      %195 = vector.broadcast %187 : vector<16x1xf32> to vector<16x32xf32>
      %196 = arith.subf %177, %195 : vector<16x32xf32>
      %cst_82 = arith.constant 9.99999974E-6 : f32
      %197 = vector.broadcast %cst_82 : f32 to vector<16x1xf32>
      %198 = arith.addf %194, %197 : vector<16x1xf32>
      %199 = math.rsqrt %198 : vector<16x1xf32>
      %200 = vector.broadcast %199 : vector<16x1xf32> to vector<16x32xf32>
      %201 = arith.mulf %196, %200 : vector<16x32xf32>
      %202 = vector.broadcast %182 : vector<1x32xf32> to vector<16x32xf32>
      %203 = arith.mulf %201, %202 : vector<16x32xf32>
      %204 = vector.broadcast %183 : vector<1x32xf32> to vector<16x32xf32>
      %205 = arith.addf %203, %204 : vector<16x32xf32>
      %206 = arith.truncf %205 : vector<16x32xf32> to vector<16x32xbf16>
      %c0_83 = arith.constant 0 : index
      %c0_84 = arith.constant 0 : index
      %207 = vector.load %arg16[%c0_83, %c0_84] : memref<32x128xbf16, #tpu.memory_space<vmem>>, vector<32x128xbf16>
      %cst_85 = arith.constant dense<0.000000e+00> : vector<16x128xf32>
      %208 = tpu.matmul %206, %207, %cst_85 {dimension_numbers = #tpu.dot_dimension_numbers<[1], [0], [0], [1], [0, 0, 1, 1], [], []>} : vector<16x32xbf16>, vector<32x128xbf16>, vector<16x128xf32> -> vector<16x128xf32>
      %c0_86 = arith.constant 0 : index
      %c0_87 = arith.constant 0 : index
      %209 = vector.load %arg17[%c0_86, %c0_87] : memref<16x128xf32, #tpu.memory_space<vmem>>, vector<16x128xf32>
      tpu.vector_store %arg17[%c0_86, %c0_87], %208 {strides = array<i32>} : memref<16x128xf32, #tpu.memory_space<vmem>>, vector<16x128xf32>,
    } else {
    }
    return
  }
  func.func @transform_0(%arg0: i32) -> (i32, i32) {
    %c0_i32 = arith.constant 0 : i32
    %c0_i32_0 = arith.constant 0 : i32
    %c0_i32_1 = arith.constant 0 : i32
    return %c0_i32, %c0_i32_0 : i32, i32
  }
  func.func @transform_1(%arg0: i32) -> (i32, i32) {
    %c0_i32 = arith.constant 0 : i32
    %c0_i32_0 = arith.constant 0 : i32
    %c0_i32_1 = arith.constant 0 : i32
    return %c0_i32, %c0_i32_0 : i32, i32
  }
  func.func @transform_2(%arg0: i32) -> (i32, i32, i32) {
    %c0_i32 = arith.constant 0 : i32
    %c0_i32_0 = arith.constant 0 : i32
    %c0_i32_1 = arith.constant 0 : i32
    return %arg0, %c0_i32, %c0_i32_0 : i32, i32, i32
  }
  func.func @transform_3(%arg0: i32) -> (i32, i32, i32) {
    %c0_i32 = arith.constant 0 : i32
    %c0_i32_0 = arith.constant 0 : i32
    %c0_i32_1 = arith.constant 0 : i32
    return %arg0, %c0_i32, %c0_i32_0 : i32, i32, i32
  }
  func.func @transform_4(%arg0: i32) -> (i32, i32, i32) {
    %c0_i32 = arith.constant 0 : i32
    %c0_i32_0 = arith.constant 0 : i32
    %c0_i32_1 = arith.constant 0 : i32
    return %arg0, %c0_i32, %c0_i32_0 : i32, i32, i32
  }
  func.func @transform_5(%arg0: i32) -> (i32, i32, i32) {
    %c0_i32 = arith.constant 0 : i32
    %c0_i32_0 = arith.constant 0 : i32
    %c0_i32_1 = arith.constant 0 : i32
    return %arg0, %c0_i32, %c0_i32_0 : i32, i32, i32
  }
  func.func @transform_6(%arg0: i32) -> (i32, i32, i32) {
    %c0_i32 = arith.constant 0 : i32
    %c0_i32_0 = arith.constant 0 : i32
    %c0_i32_1 = arith.constant 0 : i32
    return %arg0, %c0_i32, %c0_i32_0 : i32, i32, i32
  }
  func.func @transform_7(%arg0: i32) -> (i32, i32, i32) {
    %c0_i32 = arith.constant 0 : i32
    %c0_i32_0 = arith.constant 0 : i32
    %c0_i32_1 = arith.constant 0 : i32
    return %arg0, %c0_i32, %c0_i32_0 : i32, i32, i32
  }
  func.func @transform_8(%arg0: i32) -> (i32, i32, i32) {
    %c0_i32 = arith.constant 0 : i32
    %c0_i32_0 = arith.constant 0 : i32
    %c0_i32_1 = arith.constant 0 : i32
    return %arg0, %c0_i32, %c0_i32_0 : i32, i32, i32
  }
  func.func @transform_9(%arg0: i32) -> (i32, i32, i32) {
    %c0_i32 = arith.constant 0 : i32
    %c0_i32_0 = arith.constant 0 : i32
    %c0_i32_1 = arith.constant 0 : i32
    return %arg0, %c0_i32, %c0_i32_0 : i32, i32, i32
  }
  func.func @transform_10(%arg0: i32) -> (i32, i32, i32) {
    %c0_i32 = arith.constant 0 : i32
    %c0_i32_0 = arith.constant 0 : i32
    %c0_i32_1 = arith.constant 0 : i32
    return %arg0, %c0_i32, %c0_i32_0 : i32, i32, i32
  }
  func.func @transform_11(%arg0: i32) -> (i32, i32, i32) {
    %c0_i32 = arith.constant 0 : i32
    %c0_i32_0 = arith.constant 0 : i32
    %c0_i32_1 = arith.constant 0 : i32
    return %arg0, %c0_i32, %c0_i32_0 : i32, i32, i32
  }
  func.func @transform_12(%arg0: i32) -> (i32, i32, i32) {
    %c0_i32 = arith.constant 0 : i32
    %c0_i32_0 = arith.constant 0 : i32
    %c0_i32_1 = arith.constant 0 : i32
    return %arg0, %c0_i32, %c0_i32_0 : i32, i32, i32
  }
  func.func @transform_13(%arg0: i32) -> (i32, i32) {
    %c0_i32 = arith.constant 0 : i32
    %c0_i32_0 = arith.constant 0 : i32
    %c0_i32_1 = arith.constant 0 : i32
    return %c0_i32, %c0_i32_0 : i32, i32
  }
  func.func @transform_14(%arg0: i32) -> (i32, i32) {
    %c0_i32 = arith.constant 0 : i32
    %c0_i32_0 = arith.constant 0 : i32
    %c0_i32_1 = arith.constant 0 : i32
    return %c0_i32, %c0_i32_0 : i32, i32
  }
  func.func @transform_15(%arg0: i32) -> (i32, i32) {
    %c0_i32 = arith.constant 0 : i32
    %c0_i32_0 = arith.constant 0 : i32
    %c0_i32_1 = arith.constant 0 : i32
    return %c0_i32, %c0_i32_0 : i32, i32
  }
  func.func @transform_16(%arg0: i32) -> (i32, i32) {
    %c0_i32 = arith.constant 0 : i32
    %c0_i32_0 = arith.constant 0 : i32
    %c0_i32_1 = arith.constant 0 : i32
    return %c0_i32, %c0_i32_0 : i32, i32
  }
}

</mosaic_0001>

<bundles_post_ra>
// kernel: tpu_custom_call.1
= control target key start
LH: loop header
LB: loop body
LE: loop exit
PB: predicated region body
PF: predicated region fallthrough
CT: control target
= control target key end

     0   :  { %s2628_s0 = inlined_call_operand.vmem [shape: f32[16,32], index: 0, kind: input, shape index: {}]   ;;  %s2629_s1 = inlined_call_operand.vmem [shape: f32[16,16], index: 1, kind: input, shape index: {}]   ;;  %s2630_s2 = inlined_call_operand.vmem [shape: f32[2,1,32], index: 2, kind: input, shape index: {}]   ;;  %s2631_s3 = inlined_call_operand.vmem [shape: f32[2,1,32], index: 3, kind: input, shape index: {}]   ;;  %s2632_s4 = inlined_call_operand.vmem [shape: bf16[2,32,96], index: 4, kind: input, shape index: {}]   ;;  %s2633_s5 = inlined_call_operand.vmem [shape: bf16[2,32,32], index: 5, kind: input, shape index: {}]   ;;  %s2634_s6 = inlined_call_operand.vmem [shape: f32[2,1,32], index: 6, kind: input, shape index: {}]   ;;  %s2635_s7 = inlined_call_operand.vmem [shape: f32[2,1,32], index: 7, kind: input, shape index: {}]   ;;  %s2636_s8 = inlined_call_operand.vmem [shape: f32[2,1,32], index: 8, kind: input, shape index: {}]   ;;  %s2637_s9 = inlined_call_operand.vmem [shape: bf16[2,32,128], index: 9, kind: input, shape index: {}]   ;;  %s2638_s10 = inlined_call_operand.vmem [shape: f32[2,1,128], index: 10, kind: input, shape index: {}]   ;;  %s2639_s11 = inlined_call_operand.vmem [shape: bf16[2,128,32], index: 11, kind: input, shape index: {}]   ;;  %s2640_s12 = inlined_call_operand.vmem [shape: f32[2,1,32], index: 12, kind: input, shape index: {}]   ;;  %s2641_s13 = inlined_call_operand.vmem [shape: f32[1,32], index: 13, kind: input, shape index: {}]   ;;  %s2642_s14 = inlined_call_operand.vmem [shape: f32[1,32], index: 14, kind: input, shape index: {}]   ;;  %s2643_s15 = inlined_call_operand.vmem [shape: bf16[32,128], index: 15, kind: input, shape index: {}]   ;;  %s2644_s16 = inlined_call_operand.hbm [shape: f32[16,128], index: 16, kind: output, shape index: {}]  }
   0x1   :  { %2649 = sst [smem:[#allocation7_spill]] %s2628_s0 }
   0x2   :  { %2650 = sst [smem:[#allocation8_spill]] %s2632_s4 }
   0x3   :  { %2651 = sst [smem:[#allocation9_spill]] %s2633_s5 }
   0x4   :  { %2652 = sst [smem:[#allocation10_spill]] %s2641_s13 }
   0x5   :  { %2653 = sst [smem:[#allocation11_spill]] %s2642_s14 }
   0x6   :  { %2654 = sst [smem:[#allocation12_spill]] %s2643_s15 }
   0x7   :  { %2655 = sst [smem:[#allocation13_spill]] %s2644_s16 }
   0x8   :  { %21 = vsyncpa [#allocation4], 0  ;;  %s2331_s21 = smov 0  }
   0x9 LB: > { %2656 = sst [smem:[#allocation6_spill]] %s2224_s21  ;;  %s2337_s22 = sadd.s32 4294967295, %s2224_s21   ;;  %s2224_s21 = sphi %s2331_s21, %s27_s21  }
   0xa   : > { %p1886_p0 = scmp.ge.s32.totalorder %s2224_s21, 1  ;;  %p544_p1 = scmp.lt.s32.totalorder %s2224_s21, 3 }
   0xc   : > { %p545_p2 = pnand %p1886_p0, %p544_p1 }
   0xd   : > { %p625_p3 = scmp.lt.s32.totalorder (!%p545_p2), %s2337_s22, 1  ;;  %s2657_s4 = sld [smem:[#allocation8_spill]] (!%p545_p2) }
   0xe   : > { %548 = sbr.rel (%p545_p2) target bundleno = 3126 (0xc36), region = 84  ;;  %s2658_s5 = sld [smem:[#allocation9_spill]] (!%p545_p2) }
   0xf   : > { %p1895_p4 = scmp.ne.s32.totalorder (!%p545_p2), %s2337_s22, 0 }
  0x15   : > { %s2343_s23 = scalar_select %p625_p3, %s2337_s22, 1 }
  0x16   : > { %670 = sbr.rel (%p1895_p4) target bundleno = 30 (0x1e), region = 88  ;;  %s2659_s28 = sld [smem:[#allocation7_spill]] (!%p1895_p4)  ;;  %vm673_vm0 = vcmask (!%p1895_p4), 261120  }
  0x17   : > { %s1938_s30 = sshll.u32 %s2343_s23, 4  ;;  %s649_s13 = scalar_lea.vmem %s2636_s8, %s2343_s23 }
  0x18   : > { %s2361_s24 = scalar_lea.vmem %s2657_s4, %s1938_s30  ;;  %s2366_s16 = scalar_lea.vmem %s2658_s5, %s1938_s30 }
  0x19   : > { %s2379_s18 = scalar_lea.vmem %s2637_s9, %s1938_s30  ;;  %s657_s4 = scalar_lea.vmem %s2638_s10, %s2343_s23 }
  0x1a   : > { %s1941_s21 = sshll.u32 %s2343_s23, 6  ;;  %s665_s15 = scalar_lea.vmem %s2640_s12, %s2343_s23 }
  0x1b   : > { %s2393_s27 = scalar_lea.vmem %s2639_s11, %s1941_s21 }
  0x1c   : > { %v671_v0 = vld [vmem:[%s2659_s28] sm:$0xff] (!%p1895_p4)  ;;  %v672_v1 = vld [vmem:[%s2659_s28 + $0x8] sm:$0xff] (!%p1895_p4) }
  0x1d   : > { %674 = vst.msk [vmem:[#allocation2] sm:$0xff] %vm673_vm0, %v671_v0  ;;  %675 = vst.msk [vmem:[#allocation2 + $0x8] sm:$0xff] %vm673_vm0, %v672_v1 }
  0x1e PF: > { %vm682_vm1 = vcmask 261120   ;;  %v2128_v16 = vld [vmem:[%s2361_s24] sm:$0xff]   ;;  %v2226_v17 = vmov 0.0   ;;  %v2129_v18 = vld [vmem:[%s2361_s24 + $0x8] sm:$0xff]   ;;  %vm2227_vm2 = vmmov 0   ;;  %s2660_s19 = scalar_lea.vmem %s2630_s2, %s2343_s23  ;;  %s2661_s25 = scalar_lea.vmem %s2631_s3, %s2343_s23  ;;  %vm791_vm3 = vcmask 64512  }
  0x1f   : > { %1979 = vmatprep.subr.bf16.mxu0 %v2226_v17  ;;  %1999 = vmatprep.subr.bf16.mxu1 %v2226_v17  ;;  %v1896_v27 = vld [vmem:[%s2660_s19] ss:$0 sm:$0xff]  ;;  %s2228_s14 = smov 88   ;;  %s2229_s26 = smov 96   ;;  %vm843_vm4 = vcmask 130048   ;;  %v679_v60 = vld [vmem:[%s2629_s1 + $0x8] sm:$0xff] }
  0x20   : > { %1980 = vmatpush3.bf16.msra.mxu0 %v2128_v16  ;;  %1983 = vmatprep.mubr.msk.bf16.mxu0 %vm2227_vm2, %v2226_v17  ;;  %v1897_v31 = vld [vmem:[%s2661_s25] ss:$0 sm:$0xff]  ;;  %s2230_s29 = smov 120   ;;  %s2231_s30 = smov 112   ;;  %vm1317_vm5 = vcmask 195584  }
  0x21   : > { %1981 = vmatprep.subr.bf16.mxu0 %v2226_v17  ;;  %2001 = vmatprep.mubr.msk.bf16.mxu1 %vm2227_vm2, %v2226_v17  ;;  %s2232_s0 = smov 80   ;;  %s2233_s17 = smov 104   ;;  %v678_v54 = vld [vmem:[%s2629_s1] sm:$0xff] }
  0x22   : > { %s2234_s5 = smov 72   ;;  %s2235_s25 = smov 64  }
  0x23   : > { %s2662_s24 = scalar_lea.vmem %s2634_s6, %s2343_s23  ;;  %s2663_s20 = scalar_lea.vmem %s2635_s7, %s2343_s23 }
  0x24   : > { %v2402_v2 = vld [vmem:[#allocation2] sm:$0xff]  ;;  %v2404_v3 = vld [vmem:[#allocation2 + $0x8] sm:$0xff]  ;;  %1982 = vmatpush3.bf16.msra.mxu0 %v2129_v18  ;;  %p1928_p5 = scmp.ne.s32.totalorder %s2337_s22, 1 }
  0x25   : > { %v683_v4 = vsel %vm682_vm1, %v2402_v2, 0.0  ;;  %v686_v5 = vsel %vm682_vm1, %v2404_v3, 0.0  ;;  %1987 = vmatprep.subr.bf16.mxu0 %v2226_v17  ;;  %s2664_s23 = sld [smem:[#allocation12_spill]] (!%p1928_p5)  ;;  %vm2243_vm6 = vmmov (!%p1928_p5), 0   ;;  %s2666_s19 = sld [smem:[#allocation11_spill]] (!%p1928_p5) }
  0x26   : > { %684 = vadd.xlane.f32.xlu0 %v683_v4 }
  0x2a   : > { %687 = vadd.xlane.f32.xlu0 %v686_v5 }
  0xb3   : > { %v685_v6 = vpop.xlane.xlu0 %684 }
  0xb4   : > { %v690_v7 = vmul.f32 0.03125, %v685_v6 }
  0xb6   : > { %v692_v8 = vsub.f32 %v2402_v2, %v690_v7 }
  0xb7   : > { %v688_v9 = vpop.xlane.xlu0 %687 }
  0xb8   : > { %v691_v10 = vmul.f32 0.03125, %v688_v9  ;;  %v694_v11 = vmul.f32 %v692_v8, %v692_v8 }
  0xba   : > { %v693_v12 = vsub.f32 %v2404_v3, %v691_v10  ;;  %v696_v13 = vsel %vm682_vm1, %v694_v11, 0.0 }
  0xbb   : > { %697 = vadd.xlane.f32.xlu1 %v696_v13 }
  0xbc   : > { %v695_v14 = vmul.f32 %v693_v12, %v693_v12 }
  0xbe   : > { %v699_v15 = vsel %vm682_vm1, %v695_v14, 0.0 }
  0xbf   : > { %700 = vadd.xlane.f32.xlu1 %v699_v15 }
 0x148   : > { %v698_v19 = vpop.xlane.xlu1 %697 }
 0x149   : > { %v702_v20 = vmul.f32 0.03125, %v698_v19 }
 0x14b   : > { %v704_v21 = vadd.f32 1e-05, %v702_v20 }
 0x14c   : > { %v701_v22 = vpop.xlane.xlu1 %700 }
 0x14d   : > { %2142 = vrsqrt.f32 %v704_v21  ;;  %v703_v23 = vmul.f32 0.03125, %v701_v22 }
 0x14f   : > { %v705_v24 = vadd.f32 1e-05, %v703_v23 }
 0x151   : > { %2144 = vrsqrt.f32 %v705_v24 }
 0x157   : > { %v2143_v25 = vpop.eup %2142 }
 0x158   : > { %v708_v26 = vmul.f32 %v2143_v25, %v692_v8 }
 0x15a   : > { %v716_v30 = vmul.f32 %v1896_v27, %v708_v26 }
 0x15b   : > { %v2145_v28 = vpop.eup %2144 }
 0x15c   : > { %v709_v29 = vmul.f32 %v2145_v28, %v693_v12  ;;  %v724_v33 = vadd.f32 %v1897_v31, %v716_v30 }
 0x15e   : > { %v717_v32 = vmul.f32 %v1896_v27, %v709_v29 }
 0x160   : > { %v725_v34 = vadd.f32 %v1897_v31, %v717_v32 }
 0x162   : > { %v726_v35 = vpack.c.bf16 %v725_v34, %v724_v33 }
 0x164   : > { %1984 = vmatmul.mubr.msk.bf16.vlgmr.msra.gmra.mrb[0].mxu0 %vm682_vm1, %v726_v35 }
 0x165   : > { %1989 = vmatprep.mubr.msk.bf16.mxu0 %vm2227_vm2, %v2226_v17 }
 0x237   : > { %v780_v36 = vpop.f32.mrb[0].mxu0 }
 0x238   : > { %v1985_v37 = vpop.f32.mrb[1].mxu0 }
 0x239   : > { %v783_v38 = vpop.f32.mrb[2].mxu0 }
 0x23a   : > { %v2437_v39 = vpack.c.bf16 %v783_v38, %v780_v36  ;;  %v1986_v40 = vpop.f32.mrb[3].mxu0 }
 0x23c   : > { %916 = vrot.lane.b32.xlu1 %v2437_v39, %s2228_s14  ;;  %789 = vrot.lane.b32.xlu0 %v2437_v39, %s2229_s26  ;;  %s2236_s14 = smov 48   ;;  %s2237_s26 = smov 40  }
 0x240   : > { %914 = vrot.lane.b32.xlu1 %v2437_v39, %s2230_s29  ;;  %1039 = vrot.lane.b32.xlu0 %v2437_v39, %s2231_s30  ;;  %s2238_s29 = smov 56   ;;  %s2239_s30 = smov 8  }
 0x244   : > { %1041 = vrot.lane.b32.xlu1 %v2437_v39, %s2232_s0  ;;  %1164 = vrot.lane.b32.xlu0 %v2437_v39, %s2233_s17  ;;  %s2240_s0 = smov 16   ;;  %s2241_s17 = smov 24  }
 0x248   : > { %1166 = vrot.lane.b32.xlu1 %v2437_v39, %s2234_s5  ;;  %s2665_s5 = sld [smem:[#allocation10_spill]] (!%p1928_p5) }
 0x2ae   : > { %v917_v41 = vpop.permute.xlu1 %916  ;;  %v790_v42 = vpop.permute.xlu0 %789 }
 0x2af   : > { %v796_v43 = vsel %vm791_vm3, %v790_v42, 0  ;;  %v922_v44 = vsel %vm791_vm3, %v917_v41, 0 }
 0x2b0   : > { %1988 = vmatpush3.bf16.xpose.msra.mxu0 %v796_v43  ;;  %2000 = vmatpush3.bf16.xpose.msra.mxu1 %v922_v44 }
 0x2b1   : > { %2011 = vmatprep.subr.bf16.mxu1 %v2226_v17  ;;  %1993 = vmatprep.subr.bf16.mxu0 %v2226_v17 }
 0x2b2   : > { %v915_v45 = vpop.permute.xlu1 %914  ;;  %v1040_v49 = vpop.permute.xlu0 %1039 }
 0x2b6   : > { %v1042_v46 = vpop.permute.xlu1 %1041  ;;  %v1165_v51 = vpop.permute.xlu0 %1164 }
 0x2b7   : > { %v1047_v47 = vsel %vm791_vm3, %v1042_v46, 0  ;;  %1990 = vmatmul.mubr.msk.bf16.vlgmr.msra.gmra.mrb[4].mxu0 %vm791_vm3, %v2437_v39  ;;  %2002 = vmatmul.mubr.msk.bf16.vlgmr.msra.gmra.mrb[0].mxu1 %vm791_vm3, %v915_v45 }
 0x2b8   : > { %2012 = vmatpush3.bf16.xpose.msra.mxu1 %v1047_v47  ;;  %2013 = vmatprep.mubr.msk.bf16.mxu1 %vm2227_vm2, %v2226_v17 }
 0x2b9   : > { %2023 = vmatprep.subr.bf16.mxu1 %v2226_v17  ;;  %1995 = vmatprep.mubr.msk.bf16.mxu0 %vm2227_vm2, %v2226_v17 }
 0x2ba   : > { %v1167_v48 = vpop.permute.xlu1 %1166 }
 0x2bb   : > { %v1172_v50 = vsel %vm791_vm3, %v1167_v48, 0 }
 0x2bf   : > { %2014 = vmatmul.mubr.msk.bf16.vlgmr.msra.gmra.mrb[4].mxu1 %vm791_vm3, %v1040_v49 }
 0x2c0   : > { %2024 = vmatpush3.bf16.xpose.msra.mxu1 %v1172_v50  ;;  %2025 = vmatprep.mubr.msk.bf16.mxu1 %vm2227_vm2, %v2226_v17 }
 0x2c1   : > { %2035 = vmatprep.subr.bf16.mxu1 %v2226_v17 }
 0x2c7   : > { %2026 = vmatmul.mubr.msk.bf16.vlgmr.msra.gmra.mrb[8].mxu1 %vm791_vm3, %v1165_v51 }
 0x2c8   : > { %2039 = vmatprep.mubr.msk.bf16.mxu1 %vm2227_vm2, %v2226_v17 }
 0x38a   : > { %v832_v52 = vpop.f32.mrb[4].mxu0  ;;  %v958_v53 = vpop.f32.mrb[0].mxu1 }
 0x38b   : > { %v839_v55 = vmul.f32 0.35355338, %v832_v52  ;;  %v1991_v56 = vpop.f32.mrb[5].mxu0  ;;  %v2003_v57 = vpop.f32.mrb[1].mxu1  ;;  %v965_v61 = vmul.f32 0.35355338, %v958_v53 }
 0x38c   : > { %v835_v58 = vpop.f32.mrb[6].mxu0  ;;  %v961_v59 = vpop.f32.mrb[2].mxu1 }
 0x38d   : > { %v840_v62 = vmul.f32 0.35355338, %v835_v58  ;;  %v1992_v63 = vpop.f32.mrb[7].mxu0  ;;  %v2004_v0 = vpop.f32.mrb[3].mxu1  ;;  %v841_v1 = vadd.f32 %v839_v55, %v678_v54  ;;  %v966_v6 = vmul.f32 0.35355338, %v961_v59  ;;  %v967_v8 = vadd.f32 %v965_v61, %v678_v54 }
 0x38f   : > { %v844_v4 = vsel %vm843_vm4, %v841_v1, -inf  ;;  %v842_v5 = vadd.f32 %v840_v62, %v679_v60  ;;  %v969_v15 = vsel %vm843_vm4, %v967_v8, -inf  ;;  %v968_v18 = vadd.f32 %v966_v6, %v679_v60 }
 0x390   : > { %845 = vmax.xlane.f32.xlu1 %v844_v4 }
 0x391   : > { %v847_v7 = vsel %vm843_vm4, %v842_v5, -inf  ;;  %v972_v20 = vsel %vm843_vm4, %v968_v18, -inf }
 0x392   : > { %v1083_v9 = vpop.f32.mrb[4].mxu1  ;;  %848 = vmax.xlane.f32.xlu0 %v847_v7 }
 0x393   : > { %v1090_v10 = vmul.f32 0.35355338, %v1083_v9  ;;  %v2015_v11 = vpop.f32.mrb[5].mxu1 }
 0x394   : > { %v1086_v12 = vpop.f32.mrb[6].mxu1 }
 0x395   : > { %v1091_v13 = vmul.f32 0.35355338, %v1086_v12  ;;  %v2016_v14 = vpop.f32.mrb[7].mxu1  ;;  %v1092_v16 = vadd.f32 %v1090_v10, %v678_v54 }
 0x396   : > { %970 = vmax.xlane.f32.xlu0 %v969_v15 }
 0x397   : > { %v1094_v19 = vsel %vm843_vm4, %v1092_v16, -inf  ;;  %v1093_v21 = vadd.f32 %v1091_v13, %v679_v60 }
 0x398   : > { %1095 = vmax.xlane.f32.xlu1 %v1094_v19 }
 0x399   : > { %v1097_v28 = vsel %vm843_vm4, %v1093_v21, -inf }
 0x39a   : > { %v1208_v22 = vpop.f32.mrb[8].mxu1  ;;  %973 = vmax.xlane.f32.xlu0 %v972_v20 }
 0x39b   : > { %v1215_v23 = vmul.f32 0.35355338, %v1208_v22  ;;  %v2027_v24 = vpop.f32.mrb[9].mxu1 }
 0x39c   : > { %v1211_v25 = vpop.f32.mrb[10].mxu1 }
 0x39d   : > { %v1216_v26 = vmul.f32 0.35355338, %v1211_v25  ;;  %v2028_v27 = vpop.f32.mrb[11].mxu1  ;;  %v1217_v29 = vadd.f32 %v1215_v23, %v678_v54 }
 0x39e   : > { %1098 = vmax.xlane.f32.xlu0 %v1097_v28 }
 0x39f   : > { %v1219_v30 = vsel %vm843_vm4, %v1217_v29, -inf  ;;  %v1218_v31 = vadd.f32 %v1216_v26, %v679_v60 }
 0x3a0   : > { %1220 = vmax.xlane.f32.xlu1 %v1219_v30 }
 0x3a1   : > { %v1222_v32 = vsel %vm843_vm4, %v1218_v31, -inf }
 0x3a2   : > { %1223 = vmax.xlane.f32.xlu0 %v1222_v32 }
 0x3b1   : > { %867 = vrot.lane.b32.xlu1 %v2437_v39, %s2235_s25 }
 0x41d   : > { %v846_v33 = vpop.xlane.xlu1 %845 }
 0x41e   : > { %v850_v34 = vsub.f32 %v841_v1, %v846_v33 }
 0x41f   : > { %v849_v35 = vpop.xlane.xlu0 %848 }
 0x420   : > { %v852_v36 = vmul.f32 1.442695, %v850_v34  ;;  %v851_v37 = vsub.f32 %v842_v5, %v849_v35 }
 0x422   : > { %2146 = vpow2.f32 %v852_v36  ;;  %v854_v38 = vmul.f32 1.442695, %v851_v37 }
 0x423   : > { %v971_v40 = vpop.xlane.xlu0 %970 }
 0x424   : > { %2148 = vpow2.f32 %v854_v38  ;;  %v975_v41 = vsub.f32 %v967_v8, %v971_v40 }
 0x425   : > { %v1096_v42 = vpop.xlane.xlu1 %1095 }
 0x426   : > { %v977_v43 = vmul.f32 1.442695, %v975_v41  ;;  %v1100_v44 = vsub.f32 %v1092_v16, %v1096_v42 }
 0x427   : > { %v974_v45 = vpop.xlane.xlu0 %973 }
 0x428   : > { %2150 = vpow2.f32 %v977_v43  ;;  %v1102_v46 = vmul.f32 1.442695, %v1100_v44  ;;  %v976_v47 = vsub.f32 %v968_v18, %v974_v45 }
 0x42a   : > { %2152 = vpow2.f32 %v1102_v46  ;;  %v979_v48 = vmul.f32 1.442695, %v976_v47 }
 0x42b   : > { %v1099_v49 = vpop.xlane.xlu0 %1098 }
 0x42c   : > { %v2147_v50 = vpop.eup %2146  ;;  %2154 = vpow2.f32 %v979_v48  ;;  %v1101_v51 = vsub.f32 %v1093_v21, %v1099_v49 }
 0x42d   : > { %v1221_v52 = vpop.xlane.xlu1 %1220  ;;  %v856_v53 = vsel %vm843_vm4, %v2147_v50, 0.0 }
 0x42e   : > { %v2149_v54 = vpop.eup %2148  ;;  %v1104_v55 = vmul.f32 1.442695, %v1101_v51  ;;  %v1225_v56 = vsub.f32 %v1217_v29, %v1221_v52  ;;  %857 = vadd.xlane.f32.xlu1 %v856_v53  ;;  %v2130_v52 = vld [vmem:[%s2366_s16] sm:$0xff]  }
 0x42f   : > { %v1224_v57 = vpop.xlane.xlu0 %1223  ;;  %v859_v58 = vsel %vm843_vm4, %v2149_v54, 0.0  ;;  %2036 = vmatpush3.bf16.msra.mxu1 %v2130_v52 }
 0x430   : > { %2156 = vpow2.f32 %v1104_v55  ;;  %v1227_v59 = vmul.f32 1.442695, %v1225_v56  ;;  %v1226_v60 = vsub.f32 %v1218_v31, %v1224_v57  ;;  %860 = vadd.xlane.f32.xlu0 %v859_v58  ;;  %2037 = vmatprep.subr.bf16.mxu1 %v2226_v17  ;;  %v2131_v57 = vld [vmem:[%s2366_s16 + $0x8] sm:$0xff]  }
 0x431   : > { %v868_v61 = vpop.permute.xlu1 %867 }
 0x432   : > { %v2151_v62 = vpop.eup %2150  ;;  %2158 = vpow2.f32 %v1227_v59  ;;  %v1229_v63 = vmul.f32 1.442695, %v1226_v60  ;;  %1994 = vmatpush3.bf16.msra.mxu0 %v868_v61 }
 0x433   : > { %v981_v0 = vsel %vm843_vm4, %v2151_v62, 0.0  ;;  %2005 = vmatprep.subr.bf16.mxu0 %v2226_v17  ;;  %2038 = vmatpush3.bf16.msra.mxu1 %v2131_v57 }
 0x434   : > { %v2153_v1 = vpop.eup %2152  ;;  %2160 = vpow2.f32 %v1229_v63  ;;  %982 = vadd.xlane.f32.xlu1 %v981_v0  ;;  %2051 = vmatprep.subr.bf16.mxu1 %v2226_v17 }
 0x435   : > { %v1106_v5 = vsel %vm843_vm4, %v2153_v1, 0.0 }
 0x436   : > { %v2155_v4 = vpop.eup %2154 }
 0x437   : > { %v984_v6 = vsel %vm843_vm4, %v2155_v4, 0.0 }
 0x438   : > { %1107 = vadd.xlane.f32.xlu1 %v1106_v5  ;;  %985 = vadd.xlane.f32.xlu0 %v984_v6 }
 0x43a   : > { %v2157_v7 = vpop.eup %2156 }
 0x43b   : > { %v1109_v8 = vsel %vm843_vm4, %v2157_v7, 0.0 }
 0x43c   : > { %v2159_v9 = vpop.eup %2158  ;;  %1110 = vadd.xlane.f32.xlu0 %v1109_v8 }
 0x43d   : > { %v1231_v10 = vsel %vm843_vm4, %v2159_v9, 0.0 }
 0x43e   : > { %v2161_v11 = vpop.eup %2160  ;;  %1232 = vadd.xlane.f32.xlu1 %v1231_v10 }
 0x43f   : > { %v1234_v12 = vsel %vm843_vm4, %v2161_v11, 0.0 }
 0x440   : > { %1235 = vadd.xlane.f32.xlu0 %v1234_v12 }
 0x44f   : > { %1117 = vrot.lane.b32.xlu1 %v2437_v39, %s2236_s14 }
 0x453   : > { %1242 = vrot.lane.b32.xlu1 %v2437_v39, %s2237_s26 }
 0x456   : > { %992 = vrot.lane.b32.xlu0 %v2437_v39, %s2238_s29 }
 0x4bb   : > { %v858_v13 = vpop.xlane.xlu1 %857 }
 0x4bc   : > { %2162 = vrcp.f32 %v858_v13 }
 0x4bd   : > { %v861_v14 = vpop.xlane.xlu0 %860 }
 0x4be   : > { %2164 = vrcp.f32 %v861_v14 }
 0x4c1   : > { %v983_v15 = vpop.xlane.xlu1 %982 }
 0x4c2   : > { %2166 = vrcp.f32 %v983_v15 }
 0x4c5   : > { %v986_v16 = vpop.xlane.xlu0 %985  ;;  %v1108_v23 = vpop.xlane.xlu1 %1107 }
 0x4c6   : > { %v2163_v18 = vpop.eup %2162  ;;  %2168 = vrcp.f32 %v986_v16 }
 0x4c7   : > { %v864_v20 = vmul.f32 %v2163_v18, %v2147_v50 }
 0x4c8   : > { %v2165_v19 = vpop.eup %2164 }
 0x4c9   : > { %v865_v21 = vmul.f32 %v2165_v19, %v2149_v54  ;;  %v1111_v22 = vpop.xlane.xlu0 %1110 }
 0x4ca   : > { %2170 = vrcp.f32 %v1111_v22  ;;  %v1912_v22 = vld [vmem:[%s2662_s24] ss:$0 sm:$0xff] }
 0x4cb   : > { %v866_v24 = vpack.c.bf16 %v865_v21, %v864_v20  ;;  %2172 = vrcp.f32 %v1108_v23  ;;  %v1233_v26 = vpop.xlane.xlu1 %1232 }
 0x4cc   : > { %v2167_v25 = vpop.eup %2166 }
 0x4cd   : > { %1996 = vmatmul.mubr.msk.bf16.vlgmr.msra.gmra.mrb[8].mxu0 %vm843_vm4, %v866_v24  ;;  %v1236_v39 = vpop.xlane.xlu0 %1235  ;;  %v989_v29 = vmul.f32 %v2167_v25, %v2151_v62 }
 0x4ce   : > { %2007 = vmatprep.mubr.msk.bf16.mxu0 %vm2227_vm2, %v2226_v17  ;;  %2174 = vrcp.f32 %v1236_v39 }
 0x4cf   : > { %2176 = vrcp.f32 %v1233_v26  ;;  %v1118_v33 = vpop.permute.xlu1 %1117 }
 0x4d0   : > { %v2169_v27 = vpop.eup %2168 }
 0x4d1   : > { %v993_v28 = vpop.permute.xlu0 %992  ;;  %v990_v30 = vmul.f32 %v2169_v27, %v2155_v4 }
 0x4d2   : > { %2006 = vmatpush3.bf16.msra.mxu0 %v993_v28 }
 0x4d3   : > { %2017 = vmatprep.subr.bf16.mxu0 %v2226_v17  ;;  %v991_v31 = vpack.c.bf16 %v990_v30, %v989_v29  ;;  %v1243_v40 = vpop.permute.xlu1 %1242 }
 0x4d4   : > { %v2171_v32 = vpop.eup %2170 }
 0x4d5   : > { %2008 = vmatmul.mubr.msk.bf16.vlgmr.msra.gmra.mrb[12].mxu0 %vm843_vm4, %v991_v31  ;;  %v2173_v34 = vpop.eup %2172  ;;  %v1115_v35 = vmul.f32 %v2171_v32, %v2157_v7 }
 0x4d6   : > { %2018 = vmatpush3.bf16.msra.mxu0 %v1118_v33  ;;  %2019 = vmatprep.mubr.msk.bf16.mxu0 %vm2227_vm2, %v2226_v17  ;;  %v1114_v36 = vmul.f32 %v2173_v34, %v2153_v1 }
 0x4d7   : > { %2029 = vmatprep.subr.bf16.mxu0 %v2226_v17 }
 0x4d8   : > { %v1116_v37 = vpack.c.bf16 %v1115_v35, %v1114_v36  ;;  %v2175_v38 = vpop.eup %2174 }
 0x4d9   : > { %v2177_v41 = vpop.eup %2176  ;;  %v1240_v42 = vmul.f32 %v2175_v38, %v2161_v11 }
 0x4da   : > { %v1239_v43 = vmul.f32 %v2177_v41, %v2159_v9  ;;  %v2133_v41 = vld [vmem:[%s2379_s18 + $0x8] sm:$0xff]  }
 0x4dc   : > { %v1241_v44 = vpack.c.bf16 %v1240_v42, %v1239_v43  ;;  %v2134_v42 = vld [vmem:[%s2393_s27] sm:$0xff]   ;;  %v2135_v43 = vld [vmem:[%s2393_s27 + $0x8] sm:$0xff]  }
 0x4dd   : > { %2020 = vmatmul.mubr.msk.bf16.vlgmr.msra.gmra.mrb[16].mxu0 %vm843_vm4, %v1116_v37 }
 0x4de   : > { %2030 = vmatpush3.bf16.msra.mxu0 %v1243_v40  ;;  %2031 = vmatprep.mubr.msk.bf16.mxu0 %vm2227_vm2, %v2226_v17  ;;  %v2132_v40 = vld [vmem:[%s2379_s18] sm:$0xff]  }
 0x4df   : > { %2043 = vmatprep.subr.bf16.mxu0 %v2226_v17 }
 0x4e5   : > { %2032 = vmatmul.mubr.msk.bf16.vlgmr.msra.gmra.mrb[20].mxu0 %vm843_vm4, %v1241_v44  ;;  %v2136_v44 = vld [vmem:[%s2393_s27 + $0x10] sm:$0xff]  }
 0x4e6   : > { %2047 = vmatprep.mubr.msk.bf16.mxu0 %vm2227_vm2, %v2226_v17  ;;  %2044 = vmatpush3.bf16.msra.mxu0 %v2132_v40 }
 0x4e7   : > { %2045 = vmatprep.subr.bf16.mxu0 %v2226_v17 }
 0x4ea   : > { %2046 = vmatpush3.bf16.msra.mxu0 %v2133_v41 }
 0x5a0   : > { %v907_v45 = vpop.f32.mrb[8].mxu0 }
 0x5a1   : > { %v1997_v46 = vpop.f32.mrb[9].mxu0 }
 0x5a2   : > { %v910_v47 = vpop.f32.mrb[10].mxu0  ;;  %v2138_v46 = vld [vmem:[%s2393_s27 + $0x20] sm:$0xff]  }
 0x5a3   : > { %v1998_v48 = vpop.f32.mrb[11].mxu0 }
 0x5a8   : > { %v1032_v49 = vpop.f32.mrb[12].mxu0 }
 0x5a9   : > { %v2009_v50 = vpop.f32.mrb[13].mxu0 }
 0x5aa   : > { %v1035_v51 = vpop.f32.mrb[14].mxu0 }
 0x5ab   : > { %v2113_v53 = vpack.i.bf16 %v1035_v51, %v1032_v49  ;;  %v2010_v54 = vpop.f32.mrb[15].mxu0 }
 0x5ad   : > { %2114 = vrot.lane.b32.xlu1 %v2113_v53, %s2239_s30 }
 0x5b0   : > { %v1157_v55 = vpop.f32.mrb[16].mxu0 }
 0x5b1   : > { %v2021_v56 = vpop.f32.mrb[17].mxu0 }
 0x5b2   : > { %v1160_v58 = vpop.f32.mrb[18].mxu0  ;;  %v1913_v56 = vld [vmem:[%s2663_s20] ss:$0 sm:$0xff] }
 0x5b3   : > { %v2118_v59 = vpack.i.bf16 %v1160_v58, %v1157_v55  ;;  %v2022_v60 = vpop.f32.mrb[19].mxu0 }
 0x5b4   : > { %v1914_v60 = vld [vmem:[%s649_s13] ss:$0 sm:$0xff] }
 0x5b5   : > { %2119 = vrot.lane.b32.xlu0 %v2118_v59, %s2240_s0 }
 0x5b8   : > { %v1282_v61 = vpop.f32.mrb[20].mxu0 }
 0x5b9   : > { %v2033_v62 = vpop.f32.mrb[21].mxu0 }
 0x5ba   : > { %v1285_v63 = vpop.f32.mrb[22].mxu0 }
 0x5bb   : > { %v2123_v0 = vpack.i.bf16 %v1285_v63, %v1282_v61  ;;  %v2034_v1 = vpop.f32.mrb[23].mxu0 }
 0x5bc   : > { %v2140_v1 = vld [vmem:[%s2393_s27 + $0x30] sm:$0xff]  }
 0x5bd   : > { %2124 = vrot.lane.b32.xlu1 %v2123_v0, %s2241_s17 }
 0x61f   : > { %v2115_v4 = vpop.permute.xlu1 %2114 }
 0x620   : > { %v2117_v6 = vunpack.i.h.bf16 %v2115_v4  ;;  %v2116_v7 = vunpack.i.l.bf16 %v2115_v4  ;;  %v2141_v4 = vld [vmem:[%s2393_s27 + $0x38] sm:$0xff]  }
 0x622   : > { %v1314_v11 = vsel %vm791_vm3, %v910_v47, %v2117_v6  ;;  %v1313_v12 = vsel %vm791_vm3, %v907_v45, %v2116_v7  ;;  %v2137_v45 = vld [vmem:[%s2393_s27 + $0x18] sm:$0xff]   ;;  %v2139_v47 = vld [vmem:[%s2393_s27 + $0x28] sm:$0xff]  }
 0x627   : > { %v2120_v5 = vpop.permute.xlu0 %2119 }
 0x628   : > { %v2122_v8 = vunpack.i.h.bf16 %v2120_v5  ;;  %v2121_v9 = vunpack.i.l.bf16 %v2120_v5  ;;  %v1915_v5 = vld [vmem:[%s657_s4] ss:$0 sm:$0xff] }
 0x62a   : > { %v1316_v15 = vsel %vm843_vm4, %v1314_v11, %v2122_v8  ;;  %v1315_v16 = vsel %vm843_vm4, %v1313_v12, %v2121_v9 }
 0x62f   : > { %v2125_v10 = vpop.permute.xlu1 %2124 }
 0x630   : > { %v2127_v13 = vunpack.i.h.bf16 %v2125_v10  ;;  %v2126_v14 = vunpack.i.l.bf16 %v2125_v10 }
 0x632   : > { %v1319_v18 = vsel %vm1317_vm5, %v1316_v15, %v2127_v13  ;;  %v1318_v19 = vsel %vm1317_vm5, %v1315_v16, %v2126_v14 }
 0x633   : > { %v1320_v20 = vpack.c.bf16 %v1319_v18, %v1318_v19 }
 0x635   : > { %2040 = vmatmul.mubr.msk.bf16.vlgmr.msra.gmra.mrb[12].mxu1 %vm682_vm1, %v1320_v20 }
 0x636   : > { %2067 = vmatprep.mubr.msk.bf16.mxu1 %vm2227_vm2, %v2226_v17  ;;  %2052 = vmatpush3.bf16.msra.mxu1 %v2134_v42 }
 0x637   : > { %2053 = vmatprep.subr.bf16.mxu1 %v2226_v17 }
 0x63a   : > { %2054 = vmatpush3.bf16.msra.mxu1 %v2135_v43 }
 0x63b   : > { %2055 = vmatprep.subr.bf16.mxu1 %v2226_v17 }
 0x63e   : > { %2056 = vmatpush3.bf16.msra.mxu1 %v2136_v44 }
 0x63f   : > { %2057 = vmatprep.subr.bf16.mxu1 %v2226_v17 }
 0x642   : > { %2058 = vmatpush3.bf16.msra.mxu1 %v2137_v45  ;;  %v1929_v45 = vld [vmem:[%s2665_s5] ss:$0 sm:$0xff] (!%p1928_p5) }
 0x643   : > { %2059 = vmatprep.subr.bf16.mxu1 %v2226_v17 }
 0x646   : > { %2060 = vmatpush3.bf16.msra.mxu1 %v2138_v46 }
 0x647   : > { %2061 = vmatprep.subr.bf16.mxu1 %v2226_v17 }
 0x64a   : > { %2062 = vmatpush3.bf16.msra.mxu1 %v2139_v47 }
 0x64b   : > { %2063 = vmatprep.subr.bf16.mxu1 %v2226_v17 }
 0x64e   : > { %2064 = vmatpush3.bf16.msra.mxu1 %v2140_v1 }
 0x64f   : > { %2065 = vmatprep.subr.bf16.mxu1 %v2226_v17  ;;  %v1927_v17 = vld [vmem:[%s665_s15] ss:$0 sm:$0xff] }
 0x652   : > { %2066 = vmatpush3.bf16.msra.mxu1 %v2141_v4 }
 0x708   : > { %v1374_v21 = vpop.f32.mrb[12].mxu1 }
 0x709   : > { %v1381_v23 = vadd.f32 %v1374_v21, %v2402_v2  ;;  %v2041_v24 = vpop.f32.mrb[13].mxu1 }
 0x70a   : > { %v1377_v39 = vpop.f32.mrb[14].mxu1 }
 0x70b   : > { %v2527_v25 = vadd.f32 %v1912_v22, %v1381_v23  ;;  %v1382_v26 = vadd.f32 %v1377_v39, %v2404_v3  ;;  %v2042_v27 = vpop.f32.mrb[15].mxu1 }
 0x70d   : > { %v2530_v28 = vadd.f32 %v1912_v22, %v1382_v26  ;;  %v1394_v29 = vsel %vm682_vm1, %v2527_v25, 0.0 }
 0x70e   : > { %1395 = vadd.xlane.f32.xlu0 %v1394_v29 }
 0x70f   : > { %v1397_v30 = vsel %vm682_vm1, %v2530_v28, 0.0 }
 0x710   : > { %1398 = vadd.xlane.f32.xlu1 %v1397_v30 }
 0x79b   : > { %v1396_v2 = vpop.xlane.xlu0 %1395 }
 0x79c   : > { %v1400_v31 = vmul.f32 0.03125, %v1396_v2 }
 0x79d   : > { %v1399_v32 = vpop.xlane.xlu1 %1398 }
 0x79e   : > { %v1402_v33 = vsub.f32 %v2527_v25, %v1400_v31  ;;  %v1401_v3 = vmul.f32 0.03125, %v1399_v32 }
 0x7a0   : > { %v1403_v34 = vsub.f32 %v2530_v28, %v1401_v3  ;;  %v1404_v35 = vmul.f32 %v1402_v33, %v1402_v33  ;;  %v2182_v3 = vld [vmem:[%s2664_s23] sm:$0xff] (!%p1928_p5)  }
 0x7a2   : > { %v1406_v36 = vsel %vm682_vm1, %v1404_v35, 0.0  ;;  %v1405_v37 = vmul.f32 %v1403_v34, %v1403_v34  ;;  %v2183_v35 = vld [vmem:[%s2664_s23 + $0x8] sm:$0xff] (!%p1928_p5)  }
 0x7a3   : > { %1407 = vadd.xlane.f32.xlu0 %v1406_v36 }
 0x7a4   : > { %v1409_v38 = vsel %vm682_vm1, %v1405_v37, 0.0 }
 0x7a7   : > { %1410 = vadd.xlane.f32.xlu0 %v1409_v38 }
 0x830   : > { %v1408_v48 = vpop.xlane.xlu0 %1407 }
 0x831   : > { %v1412_v49 = vmul.f32 0.03125, %v1408_v48 }
 0x833   : > { %v1414_v50 = vadd.f32 1e-05, %v1412_v49  ;;  %v1930_v49 = vld [vmem:[%s2666_s19] ss:$0 sm:$0xff] (!%p1928_p5) }
 0x834   : > { %v1411_v51 = vpop.xlane.xlu0 %1410 }
 0x835   : > { %2178 = vrsqrt.f32 %v1414_v50  ;;  %v1413_v52 = vmul.f32 0.03125, %v1411_v51 }
 0x837   : > { %v1415_v53 = vadd.f32 1e-05, %v1413_v52 }
 0x839   : > { %2180 = vrsqrt.f32 %v1415_v53 }
 0x83f   : > { %v2179_v54 = vpop.eup %2178 }
 0x840   : > { %v1418_v55 = vmul.f32 %v2179_v54, %v1402_v33 }
 0x842   : > { %v1426_v58 = vmul.f32 %v1913_v56, %v1418_v55 }
 0x843   : > { %v2181_v57 = vpop.eup %2180 }
 0x844   : > { %v1419_v59 = vmul.f32 %v2181_v57, %v1403_v34  ;;  %v1434_v62 = vadd.f32 %v1914_v60, %v1426_v58  ;;  %v2242_v34 = vmov (!%p1928_p5), 0.0  }
 0x845   : > { %2071 = vmatprep.subr.bf16.mxu0 (!%p1928_p5), %v2242_v34 }
 0x846   : > { %v1427_v61 = vmul.f32 %v1913_v56, %v1419_v59 }
 0x848   : > { %v1435_v63 = vadd.f32 %v1914_v60, %v1427_v61 }
 0x84a   : > { %v1436_v0 = vpack.c.bf16 %v1435_v63, %v1434_v62 }
 0x84c   : > { %2048 = vmatmul.mubr.msk.bf16.vlgmr.msra.gmra.mrb[24].mxu0 %vm682_vm1, %v1436_v0 }
 0x84d   : > { %2075 = vmatprep.mubr.msk.bf16.mxu0 (!%p1928_p5), %vm2243_vm6, %v2242_v34  ;;  %2072 = vmatpush3.bf16.msra.mxu0 (!%p1928_p5), %v2182_v3 }
 0x84e   : > { %2073 = vmatprep.subr.bf16.mxu0 (!%p1928_p5), %v2242_v34 }
 0x851   : > { %2074 = vmatpush3.bf16.msra.mxu0 (!%p1928_p5), %v2183_v35 }
 0x91f   : > { %v1497_v6 = vpop.f32.mrb[24].mxu0 }
 0x920   : > { %v1498_v7 = vadd.f32 %v1915_v5, %v1497_v6  ;;  %v2049_v8 = vpop.f32.mrb[25].mxu0 }
 0x921   : > { %v1500_v9 = vpop.f32.mrb[26].mxu0 }
 0x922   : > { %v1501_v10 = vadd.f32 %v1915_v5, %v1500_v9  ;;  %v2050_v11 = vpop.f32.mrb[27].mxu0  ;;  %v1504_v12 = vmax.f32 %v1498_v7, 0.0 }
 0x924   : > { %v1505_v13 = vmax.f32 %v1501_v10, 0.0 }
 0x926   : > { %v1506_v14 = vpack.c.bf16 %v1505_v13, %v1504_v12 }
 0x928   : > { %2068 = vmatmul.mubr.bf16.vlgmr.msra.gmra.mrb[16].mxu1 %v1506_v14 }
 0x9fb   : > { %v1605_v15 = vpop.f32.mrb[16].mxu1 }
 0x9fc   : > { %v1612_v16 = vadd.f32 %v1605_v15, %v2527_v25  ;;  %v2069_v18 = vpop.f32.mrb[17].mxu1  ;;  %1628 = sbr.rel (%p1928_p5) target bundleno = 3094 (0xc16), region = 92 }
 0x9fd   : > { %v1608_v19 = vpop.f32.mrb[18].mxu1 }
 0x9fe   : > { %v1621_v20 = vadd.f32 %v1927_v17, %v1612_v16  ;;  %v1613_v21 = vadd.f32 %v1608_v19, %v2530_v28  ;;  %v2070_v22 = vpop.f32.mrb[19].mxu1 }
 0xa00   : > { %1623 = vst.msk [vmem:[#allocation2] sm:$0xff] %vm682_vm1, %v1621_v20  ;;  %v1622_v23 = vadd.f32 %v1927_v17, %v1613_v21  ;;  %v1631_v24 = vsel (!%p1928_p5), %vm682_vm1, %v1621_v20, 0.0 }
 0xa01   : > { %1632 = vadd.xlane.f32.xlu0 (!%p1928_p5), %v1631_v24 }
 0xa02   : > { %1624 = vst.msk [vmem:[#allocation2 + $0x8] sm:$0xff] %vm682_vm1, %v1622_v23  ;;  %v1634_v39 = vsel (!%p1928_p5), %vm682_vm1, %v1622_v23, 0.0 }
 0xa05   : > { %1635 = vadd.xlane.f32.xlu0 %v1634_v39 }
 0xa8e   : > { %v1633_v25 = vpop.xlane.xlu0 %1632 }
 0xa8f   : > { %v1637_v26 = vmul.f32 0.03125, %v1633_v25 }
 0xa91   : > { %v1639_v27 = vsub.f32 %v1621_v20, %v1637_v26 }
 0xa92   : > { %v1636_v29 = vpop.xlane.xlu0 %1635 }
 0xa93   : > { %v1638_v28 = vmul.f32 0.03125, %v1636_v29  ;;  %v1641_v30 = vmul.f32 %v1639_v27, %v1639_v27 }
 0xa95   : > { %v1640_v2 = vsub.f32 %v1622_v23, %v1638_v28  ;;  %v1643_v31 = vsel %vm682_vm1, %v1641_v30, 0.0 }
 0xa96   : > { %1644 = vadd.xlane.f32.xlu1 %v1643_v31 }
 0xa97   : > { %v1642_v32 = vmul.f32 %v1640_v2, %v1640_v2 }
 0xa99   : > { %v1646_v33 = vsel %vm682_vm1, %v1642_v32, 0.0 }
 0xa9a   : > { %1647 = vadd.xlane.f32.xlu1 %v1646_v33 }
 0xb23   : > { %v1645_v36 = vpop.xlane.xlu1 %1644 }
 0xb24   : > { %v1649_v37 = vmul.f32 0.03125, %v1645_v36 }
 0xb26   : > { %v1651_v38 = vadd.f32 1e-05, %v1649_v37 }
 0xb27   : > { %v1648_v40 = vpop.xlane.xlu1 %1647 }
 0xb28   : > { %2184 = vrsqrt.f32 %v1651_v38  ;;  %v1650_v41 = vmul.f32 0.03125, %v1648_v40 }
 0xb2a   : > { %v1652_v42 = vadd.f32 1e-05, %v1650_v41 }
 0xb2c   : > { %2186 = vrsqrt.f32 %v1652_v42 }
 0xb32   : > { %v2185_v43 = vpop.eup %2184 }
 0xb33   : > { %v1655_v44 = vmul.f32 %v2185_v43, %v1639_v27 }
 0xb35   : > { %v1663_v48 = vmul.f32 %v1929_v45, %v1655_v44 }
 0xb36   : > { %v2187_v46 = vpop.eup %2186 }
 0xb37   : > { %v1656_v47 = vmul.f32 %v2187_v46, %v1640_v2  ;;  %v1671_v51 = vadd.f32 %v1930_v49, %v1663_v48 }
 0xb39   : > { %v1664_v50 = vmul.f32 %v1929_v45, %v1656_v47 }
 0xb3b   : > { %v1672_v52 = vadd.f32 %v1930_v49, %v1664_v50 }
 0xb3d   : > { %v1673_v53 = vpack.c.bf16 %v1672_v52, %v1671_v51 }
 0xb3f   : > { %2076 = vmatmul.mubr.msk.bf16.vlgmr.msra.gmra.mrb[0].mxu0 %vm682_vm1, %v1673_v53 }
 0xc12   : > { %v1727_v54 = vpop.f32.mrb[0].mxu0 }
 0xc13   : > { %1734 = vst [vmem:[#allocation3] sm:$0xff] %v1727_v54  ;;  %v2077_v55 = vpop.f32.mrb[1].mxu0 }
 0xc14   : > { %v1730_v56 = vpop.f32.mrb[2].mxu0 }
 0xc15   : > { %1735 = vst [vmem:[#allocation3 + $0x8] sm:$0xff] %v1730_v56  ;;  %v2078_v57 = vpop.f32.mrb[3].mxu0 }
 0xc16 PF: > { %p2083_p6 = scmp.eq.s32.totalorder %s2337_s22, 1  ;;  %s2244_s20 = smov [#allocation3]  }
 0xc17   : > { %s1742_s21 = sshll.u32 %s2244_s20, 4  ;;  %s1743_s21 = int_to_ptr.vmem [resolvable:$true] %s1742_s21 }
 0xc18   : > { %s2188_s25 = scalar_lea.vmem %s1743_s21, 256  ;;  %p2195_p10 = scmp.lt.s32.totalorder %s1743_s21, %s1743_s21 }
 0xc19   : > { %p2189_p7 = scmp.ne.s32.totalorder %s1743_s21, %s2188_s25  ;;  %p2196_p11 = scmp.lt.s32.totalorder %s2188_s25, %s2188_s25 }
 0xc1b   : > { %p2190_p8 = pnand %p2189_p7, %p2083_p6  ;;  %p2197_p12 = por %p2196_p11, %p2195_p10 }
 0xc1d   : > { %p2191_p9 = pneg %p2190_p8 }
 0xc1f   : > { %p2198_p13 = pnand %p2197_p12, %p2191_p9 }
 0xc21   : > { %2201 = shalt.err (!%p2198_p13)
}
 0xc22   : > { %s2667_s13 = sld [smem:[#allocation13_spill]] }
 0xc28   : > { %s2202_s29 = scalar_lea.hbm %s2667_s13, 256 }
 0xc29   : > { %p2203_p0 = scmp.ne.s32.totalorder %s2667_s13, %s2202_s29  ;;  %p2208_p3 = scmp.lt.u32.totalorder %s2202_s29, %s2667_s13 }
 0xc2b   : > { %p2204_p1 = pnand %p2203_p0, %p2083_p6 }
 0xc2d   : > { %p2205_p2 = pneg %p2204_p1 }
 0xc2f   : > { %p2210_p4 = pnand %p2208_p3, %p2205_p2 }
 0xc31   : > { %2213 = shalt.err (!%p2210_p4)
}
 0xc32   : > { %s2245_s17 = smov 128  }
 0xc33   : > { %2080 = dma.vmem_to_hbm [thread:$0]  (%p2083_p6), %s1743_s21, 256, %s2667_s13, [#allocation4], %s2245_s17, %s2245_s17, %s2239_s30  }
 0xc34   : > { %2219 = dma.done.wait (%p2083_p6), [#allocation4], 256  }
 0xc35   : > { %2221 = vsyncadd (%p2083_p6), [#allocation4], 4294967040 }
 0xc36 PF: > { %s2668_s24 = sld [smem:[#allocation6_spill]] }
 0xc3c   : > { %s27_s21 = sadd.s32 1, %s2668_s24  }
 0xc3d   : > { %p24_p5 = scmp.ge.s32.totalorder %s27_s21, 4  }
 0xc3f   :  { %26 = sbr.rel (!%p24_p5) target bundleno = 9 (0x9), region = 149 }
 0xc46   :  { %1758 = vsyncpa [#allocation4], 1 }
 0xc47   :  { %1760 = vsyncpa [#allocation4 + $0x1], 1 }

</bundles_post_ra>
